<compile_context>
chip_gen: v7x
topology: tpu7x:2x2x1
jax: 0.10.0
libtpu: 0.0.40
codegen_flags: <defaults>
</compile_context>

<pallas_src>
import jax
import jax.numpy as jnp
from jax.experimental import pallas as pl
from jax.experimental.pallas import tpu as pltpu


def _round_up(x, m):
    return ((x + m - 1) // m) * m


def _vmem_limit_bytes():
    # Per-generation scoped-VMEM budget with headroom for Mosaic internal scratch
    # (v7x: ~41 MiB of 64 MiB; v5e/v6e: ~83 MiB of 128 MiB).
    try:
        cap = int(pltpu.get_tpu_info().vmem_capacity_bytes)
    except Exception:
        cap = 128 * 1024 * 1024
    return max(32 * 1024 * 1024, min(int(cap * 0.65), 96 * 1024 * 1024))


def _pick_tile(n):
    # Largest tile in {1024, 512, 256} that still leaves >= 2 row tiles
    # (keeps both v7x TensorCores busy on the 'parallel' axis).
    for t in (1024, 512, 256):
        if n >= 2 * t:
            return t
    return 256


# ---------------------------------------------------------------------------
# Fused GCN layer kernel:  out = relu(A_hat @ (X @ W) + b)
#   grid = (row tiles of A_hat [parallel], reduction tiles over A columns /
#           X rows [arbitrary]); W and b are VMEM-resident (constant index_map);
#   f32 VMEM accumulator, bias+ReLU on the last k step, bf16 output.
# ---------------------------------------------------------------------------
def gcn_layer_kernel(a_ref, x_ref, w_ref, b_ref, o_ref, acc_ref):
    k = pl.program_id(1)

    @pl.when(k == 0)
    def _():
        acc_ref[...] = jnp.zeros_like(acc_ref)

    # xw recompute per row tile is cheap: the kernel is HBM-bound on A_hat and
    # the MXU has ample slack. bf16 operands, f32 accumulation on the MXU.
    xw = jnp.dot(
        x_ref[...], w_ref[...], preferred_element_type=jnp.float32
    ).astype(jnp.bfloat16)
    acc_ref[...] += jnp.dot(a_ref[...], xw, preferred_element_type=jnp.float32)

    @pl.when(k == pl.num_programs(1) - 1)
    def _():
        # Epilogue on the f32 accumulator; cast once at the store (bf16 output
        # halves the h writeback + next-layer read).
        o_ref[...] = jnp.maximum(acc_ref[...] + b_ref[...], 0.0).astype(o_ref.dtype)


def gcn_layer(a_pad, x_pad, w_pad, b_pad, *, tile):
    n_pad = a_pad.shape[0]
    f_in = x_pad.shape[1]
    f_out = w_pad.shape[1]
    assert n_pad % tile == 0
    grid = (n_pad // tile, n_pad // tile)
    return pl.pallas_call(
        gcn_layer_kernel,
        out_shape=jax.ShapeDtypeStruct((n_pad, f_out), jnp.bfloat16),
        grid_spec=pltpu.PrefetchScalarGridSpec(
            num_scalar_prefetch=0,
            grid=grid,
            in_specs=[
                pl.BlockSpec((tile, tile), lambda i, k: (i, k)),    # A_hat tile
                pl.BlockSpec((tile, f_in), lambda i, k: (k, 0)),    # X tile
                pl.BlockSpec((f_in, f_out), lambda i, k: (0, 0)),   # W (resident)
                pl.BlockSpec((1, f_out), lambda i, k: (0, 0)),      # bias (resident)
            ],
            out_specs=pl.BlockSpec((tile, f_out), lambda i, k: (i, 0)),
            scratch_shapes=[pltpu.VMEM((tile, f_out), jnp.float32)],
        ),
        compiler_params=pltpu.CompilerParams(
            dimension_semantics=("parallel", "arbitrary"),
            vmem_limit_bytes=_vmem_limit_bytes(),
        ),
    )(a_pad, x_pad, w_pad, b_pad)


# ---------------------------------------------------------------------------
# Glue: dense symmetric-normalized adjacency built directly into a padded
# buffer (single scatter-add, normalize, one bf16 cast). Padded rows/cols are
# all-zero (degree 0 -> dinv 0), so padded nodes never contribute to real rows.
# ---------------------------------------------------------------------------
def build_norm_adj(edge_index, num_nodes, n_pad=None):
    if n_pad is None:
        n_pad = num_nodes
    src = edge_index[0]
    dst = edge_index[1]
    loop = jnp.arange(num_nodes, dtype=edge_index.dtype)
    src = jnp.concatenate([src, loop])
    dst = jnp.concatenate([dst, loop])
    # A[target, source] = 1 (aggregation at target). Duplicate edges accumulate
    # weight > 1, same as PyG with unit edge weights.
    a = jnp.zeros((n_pad, n_pad), jnp.float32).at[dst, src].add(1.0)
    deg = a.sum(axis=1)
    dinv = jnp.where(deg > 0.0, jax.lax.rsqrt(deg), 0.0)
    return (a * dinv[:, None] * dinv[None, :]).astype(jnp.bfloat16)


# ---------------------------------------------------------------------------
# Encoder: k = 2 GCNConv layers (in -> 2*out -> out), ReLU activation
# ---------------------------------------------------------------------------
def init_encoder_params(key, in_channels, out_channels, k=2):
    assert k >= 1
    if k == 1:
        dims = [(in_channels, out_channels)]
    else:
        dims = [(in_channels, 2 * out_channels)]
        for _ in range(1, k - 1):
            dims.append((2 * out_channels, 2 * out_channels))
        dims.append((2 * out_channels, out_channels))
    params = []
    for (fi, fo) in dims:
        key, wk = jax.random.split(key)
        limit = (6.0 / (fi + fo)) ** 0.5  # glorot-uniform
        w = jax.random.uniform(wk, (fi, fo), jnp.float32, -limit, limit)
        b = jnp.zeros((1, fo), jnp.float32)
        params.append((w, b))
    return params


def encoder_forward(x, edge_index, params, *, tile=None):
    n, f_in = x.shape
    if tile is None:
        tile = _pick_tile(n)
    n_pad = _round_up(n, tile)

    # Padded bf16 normalized adjacency (the O(N^2) operand).
    a_pad = build_norm_adj(edge_index, n, n_pad)

    # Node features: bf16, rows padded to n_pad, feature dim padded only to a
    # sublane multiple (8) — no 4x zero-traffic blowup for small f_in.
    fi_pad = _round_up(f_in, 8)
    h = jnp.zeros((n_pad, fi_pad), jnp.bfloat16).at[:n, :f_in].set(
        x.astype(jnp.bfloat16)
    )

    for (w, b) in params:
        fi, fo = w.shape
        fi_pad = h.shape[1]
        fo_pad = _round_up(fo, 128)  # lane-dense output width
        w_pad = jnp.zeros((fi_pad, fo_pad), jnp.bfloat16).at[:fi, :fo].set(
            w.astype(jnp.bfloat16)
        )
        b_pad = jnp.zeros((1, fo_pad), jnp.float32).at[:, :fo].set(b)
        # NOTE: padded rows of h receive relu(bias) but A_hat's padded columns
        # are zero, so they never leak into real rows; wrapper slices [:n].
        h = gcn_layer(a_pad, h, w_pad, b_pad, tile=tile)  # bf16 [n_pad, fo_pad]

    f_out = params[-1][0].shape[1]
    return h[:n, :f_out].astype(jnp.float32)


# Pure-JAX reference with the same bf16 quantization of A_hat / h / W and f32
# accumulation, for a tight correctness check of the kernel itself.
def encoder_reference(x, edge_index, params):
    a = build_norm_adj(edge_index, x.shape[0])
    h = x.astype(jnp.bfloat16)
    for (w, b) in params:
        xw = jnp.dot(
            h, w.astype(jnp.bfloat16), preferred_element_type=jnp.float32
        ).astype(jnp.bfloat16)
        h = jnp.maximum(
            jnp.dot(a, xw, preferred_element_type=jnp.float32) + b, 0.0
        ).astype(jnp.bfloat16)
    return h.astype(jnp.float32)


if __name__ == "__main__":
    key = jax.random.PRNGKey(0)

    # Small synthetic graph: N nodes, ring edges made undirected.
    N = 512
    in_channels = 32
    out_channels = 64
    k = 2

    nodes = jnp.arange(N, dtype=jnp.int32)
    ring_src = nodes
    ring_dst = (nodes + 1) % N
    src = jnp.concatenate([ring_src, ring_dst])
    dst = jnp.concatenate([ring_dst, ring_src])
    edge_index = jnp.stack([src, dst], axis=0)  # [2, E]

    key, xk, pk = jax.random.split(key, 3)
    x = jax.random.normal(xk, (N, in_channels), jnp.float32)
    params = init_encoder_params(pk, in_channels, out_channels, k=k)

    out = encoder_forward(x, edge_index, params)
    out = jax.block_until_ready(out)

    ref = encoder_reference(x, edge_index, params)
    assert out.shape == (N, out_channels)
    max_err = float(jnp.max(jnp.abs(out - ref)))
    assert jnp.allclose(out, ref, atol=2e-2, rtol=2e-2), max_err

    print("KERNEL_OK")
</pallas_src>

<mosaic_0001>
module attributes {stable_mosaic.version = 11 : i64} {
  func.func @gcn_layer_kernel(%arg0: i32, %arg1: i32, %arg2: memref<256x256xbf16, #tpu.memory_space<vmem>>, %arg3: memref<256x32xbf16, #tpu.memory_space<vmem>>, %arg4: memref<32x128xbf16, #tpu.memory_space<vmem>>, %arg5: memref<1x128xf32, #tpu.memory_space<vmem>>, %arg6: memref<256x128xbf16, #tpu.memory_space<vmem>>, %arg7: memref<256x128xf32, #tpu.memory_space<vmem>>) attributes {dimension_semantics = [#tpu.dimension_semantics<parallel>, #tpu.dimension_semantics<arbitrary>], iteration_bounds = array<i64: 2, 2>, scalar_prefetch = 0 : i64, scratch_operands = 1 : i64, tpu.core_type = #tpu.core_type<tc>, window_params = [{transform_indices = @transform_0, window_bounds = array<i64: 256, 256>}, {transform_indices = @transform_1, window_bounds = array<i64: 256, 32>}, {pipeline_mode = #tpu.pipeline_mode<synchronous>, transform_indices = @transform_2, window_bounds = array<i64: 32, 128>}, {pipeline_mode = #tpu.pipeline_mode<synchronous>, transform_indices = @transform_3, window_bounds = array<i64: 1, 128>}, {transform_indices = @transform_4, window_bounds = array<i64: 256, 128>}]} {
    %c0_i32 = arith.constant 0 : i32
    %0 = arith.cmpi eq, %arg1, %c0_i32 : i32
    %1 = arith.extui %0 : i1 to i32
    %c0_i32_0 = arith.constant 0 : i32
    %2 = arith.cmpi ne, %1, %c0_i32_0 : i32
    scf.if %2 {
      %cst_12 = arith.constant 0.000000e+00 : f32
      %15 = vector.broadcast %cst_12 : f32 to vector<256x128xf32>
      %c0_13 = arith.constant 0 : index
      %c0_14 = arith.constant 0 : index
      %16 = vector.load %arg7[%c0_13, %c0_14] : memref<256x128xf32, #tpu.memory_space<vmem>>, vector<256x128xf32>
      tpu.vector_store %arg7[%c0_13, %c0_14], %15 {strides = array<i32>} : memref<256x128xf32, #tpu.memory_space<vmem>>, vector<256x128xf32>,
    } else {
    }
    %c0 = arith.constant 0 : index
    %c0_1 = arith.constant 0 : index
    %3 = vector.load %arg3[%c0, %c0_1] : memref<256x32xbf16, #tpu.memory_space<vmem>>, vector<256x32xbf16>
    %c0_2 = arith.constant 0 : index
    %c0_3 = arith.constant 0 : index
    %4 = vector.load %arg4[%c0_2, %c0_3] : memref<32x128xbf16, #tpu.memory_space<vmem>>, vector<32x128xbf16>
    %cst = arith.constant dense<0.000000e+00> : vector<256x128xf32>
    %5 = tpu.matmul %3, %4, %cst {dimension_numbers = #tpu.dot_dimension_numbers<[1], [0], [0], [1], [0, 0, 1, 1], [], []>} : vector<256x32xbf16>, vector<32x128xbf16>, vector<256x128xf32> -> vector<256x128xf32>
    %6 = arith.truncf %5 : vector<256x128xf32> to vector<256x128xbf16>
    %c0_4 = arith.constant 0 : index
    %c0_5 = arith.constant 0 : index
    %7 = vector.load %arg7[%c0_4, %c0_5] : memref<256x128xf32, #tpu.memory_space<vmem>>, vector<256x128xf32>
    %c0_6 = arith.constant 0 : index
    %c0_7 = arith.constant 0 : index
    %8 = vector.load %arg2[%c0_6, %c0_7] : memref<256x256xbf16, #tpu.memory_space<vmem>>, vector<256x256xbf16>
    %cst_8 = arith.constant dense<0.000000e+00> : vector<256x128xf32>
    %9 = tpu.matmul %8, %6, %cst_8 {dimension_numbers = #tpu.dot_dimension_numbers<[1], [0], [0], [1], [0, 0, 1, 1], [], []>} : vector<256x256xbf16>, vector<256x128xbf16>, vector<256x128xf32> -> vector<256x128xf32>
    %10 = arith.addf %7, %9 : vector<256x128xf32>
    %c0_9 = arith.constant 0 : index
    %c0_10 = arith.constant 0 : index
    %11 = vector.load %arg7[%c0_9, %c0_10] : memref<256x128xf32, #tpu.memory_space<vmem>>, vector<256x128xf32>
    tpu.vector_store %arg7[%c0_9, %c0_10], %10 {strides = array<i32>} : memref<256x128xf32, #tpu.memory_space<vmem>>, vector<256x128xf32>,
    %c1_i32 = arith.constant 1 : i32
    %12 = arith.cmpi eq, %arg1, %c1_i32 : i32
    %13 = arith.extui %12 : i1 to i32
    %c0_i32_11 = arith.constant 0 : i32
    %14 = arith.cmpi ne, %13, %c0_i32_11 : i32
    scf.if %14 {
      %c0_12 = arith.constant 0 : index
      %c0_13 = arith.constant 0 : index
      %15 = vector.load %arg7[%c0_12, %c0_13] : memref<256x128xf32, #tpu.memory_space<vmem>>, vector<256x128xf32>
      %c0_14 = arith.constant 0 : index
      %c0_15 = arith.constant 0 : index
      %16 = vector.load %arg5[%c0_14, %c0_15] : memref<1x128xf32, #tpu.memory_space<vmem>>, vector<1x128xf32>
      %17 = vector.broadcast %16 : vector<1x128xf32> to vector<256x128xf32>
      %18 = arith.addf %15, %17 : vector<256x128xf32>
      %cst_16 = arith.constant 0.000000e+00 : f32
      %19 = vector.broadcast %cst_16 : f32 to vector<256x128xf32>
      %20 = arith.maximumf %18, %19 : vector<256x128xf32>
      %21 = arith.truncf %20 : vector<256x128xf32> to vector<256x128xbf16>
      %c0_17 = arith.constant 0 : index
      %c0_18 = arith.constant 0 : index
      %22 = vector.load %arg6[%c0_17, %c0_18] : memref<256x128xbf16, #tpu.memory_space<vmem>>, vector<256x128xbf16>
      tpu.vector_store %arg6[%c0_17, %c0_18], %21 {strides = array<i32>} : memref<256x128xbf16, #tpu.memory_space<vmem>>, vector<256x128xbf16>,
    } else {
    }
    return
  }
  func.func @transform_0(%arg0: i32, %arg1: i32) -> (i32, i32) {
    %c0_i32 = arith.constant 0 : i32
    return %arg0, %arg1 : i32, i32
  }
  func.func @transform_1(%arg0: i32, %arg1: i32) -> (i32, i32) {
    %c0_i32 = arith.constant 0 : i32
    %c0_i32_0 = arith.constant 0 : i32
    return %arg1, %c0_i32 : i32, i32
  }
  func.func @transform_2(%arg0: i32, %arg1: i32) -> (i32, i32) {
    %c0_i32 = arith.constant 0 : i32
    %c0_i32_0 = arith.constant 0 : i32
    %c0_i32_1 = arith.constant 0 : i32
    return %c0_i32, %c0_i32_0 : i32, i32
  }
  func.func @transform_3(%arg0: i32, %arg1: i32) -> (i32, i32) {
    %c0_i32 = arith.constant 0 : i32
    %c0_i32_0 = arith.constant 0 : i32
    %c0_i32_1 = arith.constant 0 : i32
    return %c0_i32, %c0_i32_0 : i32, i32
  }
  func.func @transform_4(%arg0: i32, %arg1: i32) -> (i32, i32) {
    %c0_i32 = arith.constant 0 : i32
    %c0_i32_0 = arith.constant 0 : i32
    return %arg0, %c0_i32 : i32, i32
  }
}

</mosaic_0001>

<bundles_post_ra>
// kernel: tpu_custom_call.1
= control target key start
LH: loop header
LB: loop body
LE: loop exit
PB: predicated region body
PF: predicated region fallthrough
CT: control target
= control target key end

     0   :  { %s3068_s0 = inlined_call_operand.hbm [shape: bf16[512,512], index: 0, kind: input, shape index: {}]   ;;  %s3069_s1 = inlined_call_operand.hbm [shape: bf16[512,32], index: 1, kind: input, shape index: {}]   ;;  %s3070_s2 = inlined_call_operand.hbm [shape: bf16[32,128], index: 2, kind: input, shape index: {}]   ;;  %s3071_s3 = inlined_call_operand.hbm [shape: f32[1,128], index: 3, kind: input, shape index: {}]   ;;  %s3072_s4 = inlined_call_operand.hbm [shape: bf16[512,128], index: 4, kind: output, shape index: {}]  }
   0x1   :  { %3092 = sst [smem:[#allocation26_spill]] %s3068_s0 }
   0x2   :  { %3093 = sst [smem:[#allocation27_spill]] %s3070_s2 }
   0x3   :  { %3094 = sst [smem:[#allocation28_spill]] %s3071_s3 }
   0x4   :  { %3095 = sst [smem:[#allocation29_spill]] %s3072_s4 }
   0x5   :  { %9 = vsyncpa [#allocation4], 0 }
   0x6   :  { %11 = vsyncpa [#allocation4 + $0x1], 0 }
   0x7   :  { %12 = vsyncpa [#allocation7], 0 }
   0x8   :  { %14 = vsyncpa [#allocation7 + $0x1], 0 }
   0x9   :  { %15 = vsyncpa [#allocation10], 0 }
   0xa   :  { %16 = vsyncpa [#allocation5], 0 }
   0xb   :  { %18 = vsyncpa [#allocation5 + $0x1], 0  ;;  %s2532_s15 = smov 0   ;;  %s2534_s16 = smov 0  }
   0xc   :  { %s2536_s17 = smov 0   ;;  %s2538_s18 = smov 0  }
   0xd   :  { %s2540_s19 = smov 0   ;;  %s2542_s20 = smov 0  }
   0xe   :  { %s2544_s21 = smov 0   ;;  %s2546_s22 = smov 0  }
   0xf   :  { %s2548_s23 = smov 0   ;;  %s2550_s24 = smov 0  }
  0x10   :  { %s2552_s25 = smov 0   ;;  %s2554_s26 = smov 0  }
  0x11   :  { %s2556_s27 = smov 0   ;;  %s2558_s28 = smov 0  }
  0x12 LB: > { %3096 = sst [smem:[#allocation17_spill]] %s2440_s15  ;;  %s2599_s29 = sadd.s32 4294967295, %s2492_s28   ;;  %s2492_s28 = sphi %s2558_s28, %s24_s28   ;;  %s2488_s27 = sphi %s2556_s27, %s3144_s27   ;;  %s2484_s26 = sphi %s2554_s26, %s3155_s26   ;;  %s2480_s25 = sphi %s2552_s25, %s3154_s25   ;;  %s2476_s24 = sphi %s2550_s24, %s3153_s24   ;;  %s2472_s23 = sphi %s2548_s23, %s3152_s23   ;;  %s2468_s22 = sphi %s2546_s22, %s3151_s22   ;;  %s2464_s21 = sphi %s2544_s21, %s3150_s21   ;;  %s2460_s20 = sphi %s2542_s20, %s3149_s20   ;;  %s2456_s19 = sphi %s2540_s19, %s3148_s19   ;;  %s2452_s18 = sphi %s2538_s18, %s3147_s18   ;;  %s2448_s17 = sphi %s2536_s17, %s3146_s17   ;;  %s2444_s16 = sphi %s2534_s16, %s3145_s16   ;;  %s2440_s15 = sphi %s2532_s15, %s3141_s15  }
  0x13   : > { %3097 = sst [smem:[#allocation18_spill]] %s2444_s16  ;;  %s1555_s30 = sadd.s32 4294967294, %s2492_s28  }
  0x14   : > { %3098 = sst [smem:[#allocation19_spill]] %s2476_s24  ;;  %p58_p0 = scmp.ne.s32.totalorder %s2468_s22, %s2464_s21 }
  0x15   : > { %3099 = sst [smem:[#allocation20_spill]] %s2480_s25  ;;  %p3076_p1 = scmp.eq.s32.totalorder %s2599_s29, 0 }
  0x16   : > { %3100 = sst [smem:[#allocation21_spill]] %s2488_s27  ;;  %p84_p2 = scmp.ne.s32.totalorder %s2456_s19, %s2452_s18 }
  0x17   : > { %p2608_p3 = por %p3076_p1, %p58_p0  ;;  %p149_p4 = scmp.ne.s32.totalorder %s2448_s17, %s2444_s16 }
  0x18   : > { %p2616_p5 = por %p84_p2, %p3076_p1  ;;  %p150_p6 = scmp.eq.s32.totalorder %s2599_s29, 3 }
  0x19   : > { %s3101_s6 = scalar_select %p2608_p3, 1, 0 }
  0x1a   : > { %s3102_s7 = scalar_select %p2616_p5, 1, 0 }
  0x1b   : > { %p155_p7 = scmp.ne.s32.totalorder %s2444_s16, %s2440_s15  ;;  %p156_p8 = scmp.eq.s32.totalorder %s1555_s30, 3 }
  0x1c   : > { %p2623_p9 = por %p150_p6, %p149_p4  ;;  %p1556_p10 = scmp.ge.s32.totalorder %s2492_s28, 1 }
  0x1d   : > { %p2628_p11 = por %p156_p8, %p155_p7  ;;  %p163_p12 = scmp.lt.s32.totalorder %s2492_s28, 5 }
  0x1e   : > { %s3103_s8 = scalar_select %p2623_p9, 1, 0 }
  0x1f   : > { %s3105_s9 = scalar_select %p2628_p11, 1, 0 }
  0x20   : > { %3104 = sst [smem:[#allocation22_spill]] %s3103_s8  ;;  %p2633_p13 = pnand %p1556_p10, %p163_p12 }
  0x21   : > { %3106 = sst [smem:[#allocation23_spill]] %s3105_s9  ;;  %s2494_s11 = smov [#allocation8]  }
  0x22   : > { %s3107_s10 = scalar_select %p2633_p13, 1, 0 }
  0x23   : > { %s175_s12 = sshll.u32 %s2494_s11, 4  ;;  %p2006_p0 = pneg %p2633_p13  ;;  %s176_s12 = int_to_ptr.vmem [resolvable:$true] %s175_s12 }
  0x24   : > { %s2495_s14 = smov [#allocation9]   ;;  %s3109_s2 = sld [smem:[#allocation27_spill]] }
  0x25   : > { %p2641_p2 = pnand %p2006_p0, %p3076_p1  ;;  %s189_s18 = sshll.u32 %s2495_s14, 4  ;;  %s2645_s18 = int_to_ptr.vmem [resolvable:$true] %s189_s18 }
  0x27   : > { %p2220_p6 = pneg %p2641_p2 }
  0x2a   : > { %s2218_s5 = scalar_lea.hbm %s3109_s2, 256 }
  0x2b   : > { %p2219_p4 = scmp.ne.s32.totalorder %s3109_s2, %s2218_s5  ;;  %p2225_p10 = scmp.lt.u32.totalorder %s2218_s5, %s3109_s2 }
  0x2d   : > { %p2221_p7 = pnand %p2220_p6, %p2219_p4 }
  0x2f   : > { %p2222_p8 = pneg %p2221_p7 }
  0x31   : > { %p2227_p12 = pnand %p2225_p10, %p2222_p8 }
  0x33   : > { %2230 = shalt.err (!%p2227_p12)
}
  0x34   : > { %s2231_s14 = scalar_lea.vmem %s176_s12, 256  ;;  %p2239_p9 = scmp.lt.s32.totalorder %s176_s12, %s176_s12 }
  0x35   : > { %p2232_p0 = scmp.ne.s32.totalorder %s176_s12, %s2231_s14  ;;  %p2240_p5 = scmp.lt.s32.totalorder %s2231_s14, %s2231_s14 }
  0x37   : > { %p2234_p1 = pnand %p2232_p0, %p2220_p6  ;;  %p2241_p3 = por %p2240_p5, %p2239_p9 }
  0x39   : > { %p2235_p11 = pneg %p2234_p1 }
  0x3b   : > { %p2242_p13 = pnand %p2241_p3, %p2235_p11 }
  0x3d   : > { %2245 = shalt.err (!%p2242_p13)
}
  0x3e   : > { %s3083_s9 = smov 64   ;;  %s3084_s21 = smov 4  }
  0x3f   : > { %2009 = dma.hbm_to_vmem [thread:$0]  (!%p2641_p2), %s3109_s2, 256, %s176_s12, [#allocation7], %s3083_s9, %s3083_s9, %s3084_s21  }
  0x40   : > { %s3110_s3 = sld [smem:[#allocation28_spill]] }
  0x46   : > { %s2246_s11 = scalar_lea.hbm %s3110_s3, 16 }
  0x47   : > { %p2247_p1 = scmp.ne.s32.totalorder %s3110_s3, %s2246_s11  ;;  %p2253_p9 = scmp.lt.u32.totalorder %s2246_s11, %s3110_s3 }
  0x49   : > { %p2249_p3 = pnand %p2247_p1, %p2220_p6 }
  0x4b   : > { %p2250_p5 = pneg %p2249_p3 }
  0x4d   : > { %p2255_p11 = pnand %p2253_p9, %p2250_p5 }
  0x4f   : > { %2258 = shalt.err (!%p2255_p11)
}
  0x50   : > { %s2259_s12 = scalar_lea.vmem %s2645_s18, 16  ;;  %s2266_s8 = scalar_lea.vmem %s2645_s18, 32 }
  0x51   : > { %p2260_p13 = scmp.ne.s32.totalorder %s2645_s18, %s2259_s12  ;;  %p2267_p8 = scmp.lt.s32.totalorder %s2645_s18, %s2645_s18 }
  0x52   : > { %p2268_p10 = scmp.lt.s32.totalorder %s2266_s8, %s2259_s12 }
  0x53   : > { %p2262_p4 = pnand %p2260_p13, %p2220_p6 }
  0x54   : > { %p2269_p12 = por %p2268_p10, %p2267_p8 }
  0x55   : > { %p2263_p7 = pneg %p2262_p4 }
  0x57   : > { %p2270_p0 = pnand %p2269_p12, %p2263_p7 }
  0x59   : > { %2273 = shalt.err (!%p2270_p0)
}
  0x5a   : > { %2012 = dma.hbm_to_vmem [thread:$0]  (!%p2641_p2), %s3110_s3, 16, %s2645_s18, [#allocation10]  }
  0x5b   : > { %s33_s4 = sadd.s32 1, %s2484_s26  ;;  %s36_s15 = sadd.s32 1, %s2488_s27 }
  0x5c   : > { %p34_p6 = scmp.ge.s32.totalorder %s33_s4, 2  ;;  %s45_s13 = sadd.s32 1, %s2472_s23 }
  0x5d   : > { %p52_p1 = scmp.ne.s32.totalorder %s2472_s23, %s2468_s22  ;;  %p3090_p3 = scmp.eq.s32.totalorder %s2492_s28, 0 }
  0x5e   : > { %s3157_s4 = smov (%p34_p6, %s33_s4), 0  ;;  %s3159_s15 = smov (!%p34_p6, %s36_s15), %s2488_s27 }
  0x5f   : > { %3111 = sst [smem:[#allocation24_spill]] %s3157_s4  ;;  %s2709_s5 = ssub.s32 %s2484_s26, %s3157_s4 }
  0x60   : > { %p2713_p2 = por %p3090_p3, %p52_p1  ;;  %p38_p5 = scmp.ge.s32.totalorder %s3159_s15, 2 }
  0x61   : > { %p69_p9 = scmp.eq.s32.totalorder %s2709_s5, 0  ;;  %p3089_p11 = scmp.lt.s32.totalorder %s2492_s28, 4 }
  0x62   : > { %s200_s30 = sand.u32 1, %s2472_s23   ;;  %s3161_s15 = smov (%p38_p5, %s3159_s15), 0 }
  0x63   : > { %3113 = sst [smem:[#allocation25_spill]] %s3161_s15  ;;  %s1560_s11 = sshll.u32 %s200_s30, 8 }
  0x64   : > { %s40_s14 = ssub.s32 %s2488_s27, %s3161_s15  ;;  %s1562_s8 = sshll.u32 %s2484_s26, 1 }
  0x65   : > { %s42_s12 = sor.u32 %s2709_s5, %s40_s14  ;;  %p137_p13 = scmp.eq.s32.totalorder %s40_s14, 0 }
  0x66   : > { %p43_p4 = scmp.eq.s32.totalorder %s42_s12, 0  ;;  %s3114_s24 = sadd.s32 1, %s2448_s17 }
  0x67   : > { %s2729_s25 = scalar_select %p137_p13, %s2448_s17, %s3114_s24  }
  0x68   : > { %s2732_s9 = scalar_select %p43_p4, %s2472_s23, %s45_s13  }
  0x69   : > { %s1680_s21 = sshll.u32 %s2488_s27, 7  ;;  %s204_s2 = scalar_lea.vmem [#allocation3], %s1560_s11 }
  0x6a   : > { %s214_s3 = sshll.u32 %s204_s2, 4  ;;  %s211_s4 = sadd.s32 %s1680_s21, %s1562_s8  ;;  %s2735_s3 = int_to_ptr.vmem [resolvable:$true] %s214_s3 }
  0x6b   : > { %s1564_s16 = sshll.u32 %s211_s4, 6  ;;  %p2741_p7 = pnand %p3089_p11, %p2713_p2 }
  0x6c   : > { %s3116_s0 = sld [smem:[#allocation26_spill]]  ;;  %s2750_s2 = scalar_lea.sflag [#allocation4], %s200_s30 }
  0x6d   : > { %p2276_p10 = pneg %p2741_p7 }
  0x72   : > { %s2748_s13 = scalar_lea.hbm %s3116_s0, %s1564_s16  ;;  %s2279_s11 = scalar_lea.hbm %s3116_s0, 16384 }
  0x73   : > { %s2274_s21 = scalar_lea.hbm %s2748_s13, 4096  ;;  %p2280_p6 = scmp.lt.u32.totalorder %s2748_s13, %s3116_s0 }
  0x74   : > { %p2275_p8 = scmp.ne.s32.totalorder %s2748_s13, %s2274_s21  ;;  %p2281_p1 = scmp.lt.u32.totalorder %s2279_s11, %s2274_s21 }
  0x75   : > { %p2283_p5 = scmp.lt.u32.totalorder %s2274_s21, %s2748_s13 }
  0x76   : > { %p2277_p12 = pnand %p2276_p10, %p2275_p8  ;;  %p2282_p2 = por %p2281_p1, %p2280_p6 }
  0x78   : > { %p2278_p0 = pneg %p2277_p12  ;;  %p2284_p13 = por %p2283_p5, %p2282_p2 }
  0x7a   : > { %p2285_p4 = pnand %p2284_p13, %p2278_p0 }
  0x7c   : > { %2288 = shalt.err (!%p2285_p4)
}
  0x7d   : > { %s2289_s30 = scalar_lea.vmem %s2735_s3, 4096  ;;  %s2498_s24 = smov [#allocation3]  }
  0x7e   : > { %p2290_p8 = scmp.ne.s32.totalorder %s2735_s3, %s2289_s30  ;;  %s2294_s14 = sshll.u32 %s2498_s24, 4  ;;  %s2295_s14 = int_to_ptr.vmem [resolvable:$false] %s2294_s14 }
  0x7f   : > { %s2296_s12 = scalar_lea.vmem %s2295_s14, 8192  ;;  %p2297_p3 = scmp.lt.s32.totalorder %s2735_s3, %s2295_s14 }
  0x80   : > { %p2292_p12 = pnand %p2290_p8, %p2276_p10  ;;  %p2298_p6 = scmp.lt.s32.totalorder %s2296_s12, %s2289_s30 }
  0x82   : > { %p2293_p11 = pneg %p2292_p12  ;;  %p2299_p1 = por %p2298_p6, %p2297_p3 }
  0x84   : > { %p2300_p2 = pnand %p2299_p1, %p2293_p11 }
  0x86   : > { %2303 = shalt.err (!%p2300_p2)
}
  0x87   : > { %s2499_s21 = smov 256   ;;  %s2500_s4 = smov 128  }
  0x88   : > { %s2501_s18 = smov 8   ;;  %s224_s11 = sand.u32 1, %s2492_s28  }
  0x89   : > { %2016 = dma.hbm_to_vmem [thread:$0]  (!%p2741_p7), %s2748_s13, 4096, %s2735_s3, %s2750_s2, %s2499_s21, %s2500_s4, %s2501_s18  }
  0x8a   : > { %s71_s16 = sadd.s32 1, %s2460_s20  ;;  %p78_p3 = scmp.ne.s32.totalorder %s2460_s20, %s2456_s19 }
  0x8b   : > { %s2785_s8 = scalar_select %p69_p9, %s2460_s20, %s71_s16  }
  0x8c   : > { %p3117_p11 = scmp.eq.s32.totalorder %s2492_s28, 0  ;;  %s226_s30 = sand.u32 1, %s2460_s20  }
  0x8d   : > { %s1681_s24 = sshll.u32 %s2484_s26, 11  ;;  %s1565_s14 = sshll.u32 %s226_s30, 7 }
  0x8e   : > { %p80_p10 = por %p78_p3, %p3117_p11  ;;  %s2794_s27 = scalar_lea.hbm %s3069_s1, %s1681_s24 }
  0x8f   : > { %p3118_p0 = scmp.lt.s32.totalorder %s2492_s28, 4  ;;  %s228_s15 = scalar_lea.vmem [#allocation6], %s1565_s14 }
  0x90   : > { %s235_s5 = sshll.u32 %s228_s15, 4  ;;  %s2804_s13 = scalar_lea.sflag [#allocation7], %s224_s11  ;;  %s2802_s5 = int_to_ptr.vmem [resolvable:$true] %s235_s5 }
  0x91   : > { %p2798_p7 = pnand %p3118_p0, %p80_p10  ;;  %s2304_s0 = scalar_lea.hbm %s2794_s27, 2048 }
  0x92   : > { %p2305_p9 = scmp.ne.s32.totalorder %s2794_s27, %s2304_s0  ;;  %s2309_s4 = scalar_lea.hbm %s3069_s1, 4096 }
  0x93   : > { %p2306_p5 = pneg %p2798_p7  ;;  %p2310_p8 = scmp.lt.u32.totalorder %s2794_s27, %s3069_s1 }
  0x94   : > { %p2311_p12 = scmp.lt.u32.totalorder %s2309_s4, %s2304_s0  ;;  %p2313_p1 = scmp.lt.u32.totalorder %s2304_s0, %s2794_s27 }
  0x95   : > { %p2307_p13 = pnand %p2306_p5, %p2305_p9 }
  0x96   : > { %p2312_p6 = por %p2311_p12, %p2310_p8 }
  0x97   : > { %p2308_p4 = pneg %p2307_p13 }
  0x98   : > { %p2314_p2 = por %p2313_p1, %p2312_p6 }
  0x9a   : > { %p2315_p3 = pnand %p2314_p2, %p2308_p4 }
  0x9c   : > { %2318 = shalt.err (!%p2315_p3)
}
  0x9d   : > { %s2319_s11 = scalar_lea.vmem %s2802_s5, 2048  ;;  %s2502_s30 = smov [#allocation6]  }
  0x9e   : > { %p2320_p11 = scmp.ne.s32.totalorder %s2802_s5, %s2319_s11  ;;  %s2324_s24 = sshll.u32 %s2502_s30, 4  ;;  %s2325_s24 = int_to_ptr.vmem [resolvable:$false] %s2324_s24 }
  0x9f   : > { %s2326_s14 = scalar_lea.vmem %s2325_s24, 4096  ;;  %p2327_p9 = scmp.lt.s32.totalorder %s2802_s5, %s2325_s24 }
  0xa0   : > { %p2322_p10 = pnand %p2320_p11, %p2306_p5  ;;  %p2328_p13 = scmp.lt.s32.totalorder %s2326_s14, %s2319_s11 }
  0xa2   : > { %p2323_p0 = pneg %p2322_p10  ;;  %p2329_p8 = por %p2328_p13, %p2327_p9 }
  0xa4   : > { %p2330_p12 = pnand %p2329_p8, %p2323_p0 }
  0xa6   : > { %2333 = shalt.err (!%p2330_p12)
}
  0xa7   : > { %s3120_s12 = smov 4   ;;  %s3121_s15 = smov 64  }
  0xa8   : > { %2019 = dma.hbm_to_vmem [thread:$0]  (!%p2798_p7), %s2794_s27, 2048, %s2802_s5, %s2804_s13, %s3121_s15, %s3121_s15, %s3120_s12  }
  0xa9   : > { %p3122_p5 = scmp.ne.s32.totalorder %s3107_s10, 0 }
  0xaa   : > { %s249_s0 = sand.u32 (!%p3122_p5), 1, %s2468_s22   ;;  %p3123_p4 = scmp.ne.s32.totalorder (!%p3122_p5), %s3101_s6, 0 }
  0xab   : > { %247 = sbr.rel (%p3122_p5) target bundleno = 847 (0x34f), region = 36  ;;  %s1569_s2 = sshll.u32 (!%p3122_p5), %s249_s0, 8 }
  0xac   : > { %s250_s21 = scalar_lea.sflag (!%p3122_p5), [#allocation4], %s249_s0  ;;  %s2838_s4 = scalar_lea.vmem (!%p3122_p5), [#allocation3], %s1569_s2 }
  0xb2   : > { %2419 = dma.done.wait (%p3123_p4), %s250_s21, 4096  }
  0xb3   : > { %2421 = vsyncadd (%p3123_p4), %s250_s21, 4294963200  ;;  %s258_s3 = sand.u32 1, %s2599_s29   ;;  %s260_s27 = sand.u32 1, %s2456_s19  }
  0xb4   : > { %s1570_s5 = sshll.u32 %s260_s27, 7  ;;  %s259_s10 = scalar_lea.sflag [#allocation7], %s258_s3 }
  0xb5   : > { %s2846_s13 = scalar_lea.vmem [#allocation6], %s1570_s5  ;;  %p3124_p7 = scmp.ne.s32.totalorder %s3102_s7, 0 }
  0xb7   : > { %2423 = dma.done.wait (%p3124_p7), %s259_s10, 2048  }
  0xb8   : > { %2425 = vsyncadd (%p3124_p7), %s259_s10, 4294965248  ;;  %p3125_p6 = scmp.eq.s32.totalorder %s2599_s29, 0 }
  0xba   : > { %2427 = dma.done.wait (%p3125_p6), [#allocation7], 256   ;;  %p3126_p1 = pmov %p3125_p6 }
  0xbc   : > { %2429 = vsyncadd (%p3126_p1), [#allocation7], 4294967040  ;;  %p3127_p2 = pmov %p3126_p1 }
  0xbd   : > { %p3128_p3 = pmov %p3126_p1 }
  0xbe   : > { %2431 = dma.done.wait (%p3127_p2), [#allocation10], 16  }
  0xbf   : > { %2433 = vsyncadd (%p3128_p3), [#allocation10], 4294967280  ;;  %s3129_s6 = sld [smem:[#allocation18_spill]]  ;;  %s3130_s7 = sld [smem:[#allocation19_spill]] }
  0xc5   : > { %s297_s18 = sand.u32 1, %s3129_s6   ;;  %p1574_p11 = scmp.ne.s32.totalorder %s3130_s7, 0 }
  0xc6   : > { %s1573_s16 = sshll.u32 %s297_s18, 7  ;;  %v2503_v0 = vmov (!%p1574_p11), 0.0  }
  0xc7   : > { %s2863_s11 = scalar_lea.vmem [#allocation11], %s1573_s16  ;;  %308 = sbr.rel (%p1574_p11) target bundleno = 215 (0xd7), region = 56  ;;  %309 = vst [vmem:[#allocation2] sm:$0xff] (!%p1574_p11), %v2503_v0  ;;  %310 = vst [vmem:[#allocation2 + $0x8] sm:$0xff] (!%p1574_p11), %v2503_v0 }
  0xc8   : > { %311 = vst [vmem:[#allocation2 + $0x10] sm:$0xff] (!%p1574_p11), %v2503_v0  ;;  %312 = vst [vmem:[#allocation2 + $0x18] sm:$0xff] (!%p1574_p11), %v2503_v0 }
  0xc9   : > { %313 = vst [vmem:[#allocation2 + $0x20] sm:$0xff] (!%p1574_p11), %v2503_v0  ;;  %314 = vst [vmem:[#allocation2 + $0x28] sm:$0xff] (!%p1574_p11), %v2503_v0 }
  0xca   : > { %315 = vst [vmem:[#allocation2 + $0x30] sm:$0xff] (!%p1574_p11), %v2503_v0  ;;  %316 = vst [vmem:[#allocation2 + $0x38] sm:$0xff] (!%p1574_p11), %v2503_v0 }
  0xcb   : > { %317 = vst [vmem:[#allocation2 + $0x40] sm:$0xff] (!%p1574_p11), %v2503_v0  ;;  %318 = vst [vmem:[#allocation2 + $0x48] sm:$0xff] (!%p1574_p11), %v2503_v0 }
  0xcc   : > { %319 = vst [vmem:[#allocation2 + $0x50] sm:$0xff] (!%p1574_p11), %v2503_v0  ;;  %320 = vst [vmem:[#allocation2 + $0x58] sm:$0xff] (!%p1574_p11), %v2503_v0 }
  0xcd   : > { %321 = vst [vmem:[#allocation2 + $0x60] sm:$0xff] (!%p1574_p11), %v2503_v0  ;;  %322 = vst [vmem:[#allocation2 + $0x68] sm:$0xff] (!%p1574_p11), %v2503_v0 }
  0xce   : > { %323 = vst [vmem:[#allocation2 + $0x70] sm:$0xff] %v2503_v0  ;;  %324 = vst [vmem:[#allocation2 + $0x78] sm:$0xff] %v2503_v0 }
  0xcf   : > { %325 = vst [vmem:[#allocation2 + $0x80] sm:$0xff] %v2503_v0  ;;  %326 = vst [vmem:[#allocation2 + $0x88] sm:$0xff] %v2503_v0 }
  0xd0   : > { %327 = vst [vmem:[#allocation2 + $0x90] sm:$0xff] %v2503_v0  ;;  %328 = vst [vmem:[#allocation2 + $0x98] sm:$0xff] %v2503_v0 }
  0xd1   : > { %329 = vst [vmem:[#allocation2 + $0xa0] sm:$0xff] %v2503_v0  ;;  %330 = vst [vmem:[#allocation2 + $0xa8] sm:$0xff] %v2503_v0 }
  0xd2   : > { %331 = vst [vmem:[#allocation2 + $0xb0] sm:$0xff] %v2503_v0  ;;  %332 = vst [vmem:[#allocation2 + $0xb8] sm:$0xff] %v2503_v0 }
  0xd3   : > { %333 = vst [vmem:[#allocation2 + $0xc0] sm:$0xff] %v2503_v0  ;;  %334 = vst [vmem:[#allocation2 + $0xc8] sm:$0xff] %v2503_v0 }
  0xd4   : > { %335 = vst [vmem:[#allocation2 + $0xd0] sm:$0xff] %v2503_v0  ;;  %336 = vst [vmem:[#allocation2 + $0xd8] sm:$0xff] %v2503_v0 }
  0xd5   : > { %337 = vst [vmem:[#allocation2 + $0xe0] sm:$0xff] %v2503_v0  ;;  %338 = vst [vmem:[#allocation2 + $0xe8] sm:$0xff] %v2503_v0 }
  0xd6   : > { %339 = vst [vmem:[#allocation2 + $0xf0] sm:$0xff] %v2503_v0  ;;  %340 = vst [vmem:[#allocation2 + $0xf8] sm:$0xff] %v2503_v0 }
  0xd7 PF: > { %v2152_v1 = vld [vmem:[#allocation8] sm:$0xff]   ;;  %v2153_v2 = vld [vmem:[#allocation8 + $0x8] sm:$0xff]   ;;  %vm469_vm0 = vcmask 261120   ;;  %v2156_v5 = vld [vmem:[%s2846_s13 + $0x10] sm:$0xff]   ;;  %s3131_s29 = sld [smem:[#allocation19_spill]] }
  0xd8   : > { %1940 = vmatprep.subr.bf16.mxu0 %v2152_v1  ;;  %v2154_v3 = vld [vmem:[%s2846_s13] sm:$0xff]   ;;  %v2155_v4 = vld [vmem:[%s2846_s13 + $0x8] sm:$0xff]   ;;  %v2157_v6 = vld [vmem:[%s2846_s13 + $0x18] sm:$0xff]  }
  0xd9   : > { %1941 = vmatpush3.bf16.msra.mxu0 %v2152_v1  ;;  %1944 = vmatprep.mubr.msk.bf16.mxu0 %vm469_vm0, %v2154_v3  ;;  %v2158_v7 = vld [vmem:[%s2846_s13 + $0x20] sm:$0xff]   ;;  %v2159_v8 = vld [vmem:[%s2846_s13 + $0x28] sm:$0xff]   ;;  %v2160_v9 = vld [vmem:[%s2846_s13 + $0x30] sm:$0xff]  }
  0xda   : > { %1942 = vmatprep.subr.bf16.mxu0 %v2153_v2  ;;  %v2161_v10 = vld [vmem:[%s2846_s13 + $0x38] sm:$0xff]   ;;  %v2162_v11 = vld [vmem:[%s2846_s13 + $0x40] sm:$0xff]   ;;  %v2163_v12 = vld [vmem:[%s2846_s13 + $0x48] sm:$0xff]  }
  0xdb   : > { %v2164_v13 = vld [vmem:[%s2846_s13 + $0x50] sm:$0xff]   ;;  %v2165_v14 = vld [vmem:[%s2846_s13 + $0x58] sm:$0xff]   ;;  %v2166_v15 = vld [vmem:[%s2846_s13 + $0x60] sm:$0xff]  }
  0xdc   : > { %v2167_v16 = vld [vmem:[%s2846_s13 + $0x68] sm:$0xff]   ;;  %v2168_v17 = vld [vmem:[%s2846_s13 + $0x70] sm:$0xff]   ;;  %v2169_v18 = vld [vmem:[%s2846_s13 + $0x78] sm:$0xff]  }
  0xdd   : > { %1943 = vmatpush3.bf16.msra.mxu0 %v2153_v2  ;;  %v2172_v19 = vld [vmem:[%s2838_s4 + $0x54] ss:$8 sps:$4 sm:$0xff]   ;;  %v2190_v20 = vld [vmem:[%s2838_s4 + $0x4] ss:$8 sps:$4 sm:$0xff]   ;;  %p1641_p10 = scmp.ne.s32.totalorder %s3131_s29, 1 }
  0xde   : > { %991 = vmatprep.mubr.bf16.mxu1 %v2172_v19  ;;  %v2182_v19 = vld [vmem:[%s2838_s4 + $0x94] ss:$8 sps:$4 sm:$0xff]  }
  0xe0   : > { %1945 = vmatmul.mubr.msk.bf16.vlgmr.msra.gmra.mrb[0].mxu0 %vm469_vm0, %v2155_v4 }
  0xe1   : > { %1948 = vmatprep.mubr.msk.bf16.mxu0 %vm469_vm0, %v2156_v5  ;;  %v2170_v5 = vld [vmem:[%s2838_s4 + $0x50] ss:$8 sps:$4 sm:$0xff]  }
  0xe8   : > { %1949 = vmatmul.mubr.msk.bf16.gmra.mrb[4].mxu0 %vm469_vm0, %v2157_v6  ;;  %v2188_v6 = vld [vmem:[%s2838_s4] ss:$8 sps:$4 sm:$0xff]  }
  0xe9   : > { %1952 = vmatprep.mubr.msk.bf16.mxu0 %vm469_vm0, %v2158_v7  ;;  %v2173_v7 = vld [vmem:[%s2838_s4 + $0x64] ss:$8 sps:$4 sm:$0xff]  }
  0xf0   : > { %1953 = vmatmul.mubr.msk.bf16.gmra.mrb[8].mxu0 %vm469_vm0, %v2159_v8  ;;  %v2194_v8 = vld [vmem:[%s2838_s4 + $0x14] ss:$8 sps:$4 sm:$0xff]  }
  0xf1   : > { %1956 = vmatprep.mubr.msk.bf16.mxu0 %vm469_vm0, %v2160_v9  ;;  %v2175_v9 = vld [vmem:[%s2838_s4 + $0x60] ss:$8 sps:$4 sm:$0xff]  }
  0xf8   : > { %1957 = vmatmul.mubr.msk.bf16.gmra.mrb[12].mxu0 %vm469_vm0, %v2161_v10  ;;  %v2196_v10 = vld [vmem:[%s2838_s4 + $0x10] ss:$8 sps:$4 sm:$0xff]  }
  0xf9   : > { %1960 = vmatprep.mubr.msk.bf16.mxu0 %vm469_vm0, %v2162_v11  ;;  %v2176_v11 = vld [vmem:[%s2838_s4 + $0x74] ss:$8 sps:$4 sm:$0xff]  }
 0x100   : > { %1961 = vmatmul.mubr.msk.bf16.gmra.mrb[16].mxu0 %vm469_vm0, %v2163_v12  ;;  %v2200_v12 = vld [vmem:[%s2838_s4 + $0x24] ss:$8 sps:$4 sm:$0xff]  }
 0x101   : > { %1964 = vmatprep.mubr.msk.bf16.mxu0 %vm469_vm0, %v2164_v13  ;;  %v2178_v13 = vld [vmem:[%s2838_s4 + $0x70] ss:$8 sps:$4 sm:$0xff]  }
 0x108   : > { %1965 = vmatmul.mubr.msk.bf16.gmra.mrb[20].mxu0 %vm469_vm0, %v2165_v14  ;;  %v2202_v14 = vld [vmem:[%s2838_s4 + $0x20] ss:$8 sps:$4 sm:$0xff]  }
 0x109   : > { %1968 = vmatprep.mubr.msk.bf16.mxu0 %vm469_vm0, %v2166_v15  ;;  %v2179_v15 = vld [vmem:[%s2838_s4 + $0x84] ss:$8 sps:$4 sm:$0xff]  }
 0x110   : > { %1969 = vmatmul.mubr.msk.bf16.gmra.mrb[24].mxu0 %vm469_vm0, %v2167_v16  ;;  %v2206_v16 = vld [vmem:[%s2838_s4 + $0x34] ss:$8 sps:$4 sm:$0xff]  }
 0x111   : > { %1972 = vmatprep.mubr.msk.bf16.mxu0 %vm469_vm0, %v2168_v17  ;;  %v2181_v17 = vld [vmem:[%s2838_s4 + $0x80] ss:$8 sps:$4 sm:$0xff]  }
 0x118   : > { %1973 = vmatmul.mubr.msk.bf16.gmra.mrb[28].mxu0 %vm469_vm0, %v2169_v18  ;;  %v2208_v18 = vld [vmem:[%s2838_s4 + $0x30] ss:$8 sps:$4 sm:$0xff]  }
 0x119   : > { %951 = vmatprep.mubr.bf16.mxu0 %v2190_v20  ;;  %v2212_v20 = vld [vmem:[%s2838_s4 + $0x44] ss:$8 sps:$4 sm:$0xff]  }
 0x1b3   : > { %v1946_v21 = vpop.f32.mrb[0].mxu0 }
 0x1b4   : > { %v552_v22 = vpop.f32.mrb[1].mxu0 }
 0x1b5   : > { %v1947_v23 = vpop.f32.mrb[2].mxu0 }
 0x1b6   : > { %v680_v24 = vpack.c.bf16 %v1947_v23, %v1946_v21  ;;  %v555_v25 = vpop.f32.mrb[3].mxu0  ;;  %v2184_v21 = vld [vmem:[%s2838_s4 + $0x90] ss:$8 sps:$4 sm:$0xff]   ;;  %v2185_v23 = vld [vmem:[%s2838_s4 + $0xa4] ss:$8 sps:$4 sm:$0xff]  }
 0x1b7   : > { %v679_v26 = vpack.c.bf16 %v555_v25, %v552_v22  ;;  %v2214_v22 = vld [vmem:[%s2838_s4 + $0x40] ss:$8 sps:$4 sm:$0xff]   ;;  %v2191_v25 = vld [vmem:[%s2838_s4 + $0xb4] ss:$8 sps:$4 sm:$0xff]  }
 0x1bb   : > { %v1950_v27 = vpop.f32.mrb[4].mxu0 }
 0x1bc   : > { %v568_v28 = vpop.f32.mrb[5].mxu0 }
 0x1bd   : > { %v1951_v29 = vpop.f32.mrb[6].mxu0 }
 0x1be   : > { %v682_v30 = vpack.c.bf16 %v1951_v29, %v1950_v27  ;;  %v571_v31 = vpop.f32.mrb[7].mxu0  ;;  %v2197_v27 = vld [vmem:[%s2838_s4 + $0xc4] ss:$8 sps:$4 sm:$0xff]   ;;  %v2203_v29 = vld [vmem:[%s2838_s4 + $0xd4] ss:$8 sps:$4 sm:$0xff]  }
 0x1bf   : > { %v681_v32 = vpack.c.bf16 %v571_v31, %v568_v28  ;;  %v2199_v28 = vld [vmem:[%s2838_s4 + $0xc0] ss:$8 sps:$4 sm:$0xff]   ;;  %v2209_v31 = vld [vmem:[%s2838_s4 + $0xe4] ss:$8 sps:$4 sm:$0xff]  }
 0x1c3   : > { %v1954_v33 = vpop.f32.mrb[8].mxu0 }
 0x1c4   : > { %v584_v34 = vpop.f32.mrb[9].mxu0 }
 0x1c5   : > { %v1955_v35 = vpop.f32.mrb[10].mxu0 }
 0x1c6   : > { %v684_v36 = vpack.c.bf16 %v1955_v35, %v1954_v33  ;;  %v587_v37 = vpop.f32.mrb[11].mxu0  ;;  %v2215_v33 = vld [vmem:[%s2838_s4 + $0xf4] ss:$8 sps:$4 sm:$0xff]  }
 0x1c7   : > { %v683_v38 = vpack.c.bf16 %v587_v37, %v584_v34  ;;  %v2217_v34 = vld [vmem:[%s2838_s4 + $0xf0] ss:$8 sps:$4 sm:$0xff]  }
 0x1c8   : > { %v705_v37 = vld [vmem:[#allocation2 + $0x50] sm:$0xff] }
 0x1cb   : > { %v1958_v39 = vpop.f32.mrb[12].mxu0 }
 0x1cc   : > { %v600_v40 = vpop.f32.mrb[13].mxu0 }
 0x1cd   : > { %v1959_v41 = vpop.f32.mrb[14].mxu0 }
 0x1ce   : > { %v686_v42 = vpack.c.bf16 %v1959_v41, %v1958_v39  ;;  %v603_v43 = vpop.f32.mrb[15].mxu0  ;;  %v695_v39 = vld [vmem:[#allocation2] sm:$0xff] }
 0x1cf   : > { %v685_v44 = vpack.c.bf16 %v603_v43, %v600_v40 }
 0x1d3   : > { %v1962_v45 = vpop.f32.mrb[16].mxu0 }
 0x1d4   : > { %v616_v46 = vpop.f32.mrb[17].mxu0 }
 0x1d5   : > { %v1963_v47 = vpop.f32.mrb[18].mxu0 }
 0x1d6   : > { %v688_v48 = vpack.c.bf16 %v1963_v47, %v1962_v45  ;;  %v619_v49 = vpop.f32.mrb[19].mxu0  ;;  %v706_v45 = vld [vmem:[#allocation2 + $0x58] sm:$0xff]  ;;  %v696_v47 = vld [vmem:[#allocation2 + $0x8] sm:$0xff] }
 0x1d7   : > { %v687_v50 = vpack.c.bf16 %v619_v49, %v616_v46 }
 0x1d9   : > { %1828 = vmatprep.subr.bf16.mxu0 %v687_v50  ;;  %1976 = vmatprep.subr.bf16.mxu1 %v687_v50 }
 0x1da   : > { %1829 = vmatpush3.bf16.msra.mxu0 %v679_v26  ;;  %1984 = vmatpush3.bf16.msra.mxu1 %v679_v26  ;;  %v2193_v26 = vld [vmem:[%s2838_s4 + $0xb0] ss:$8 sps:$4 sm:$0xff]  }
 0x1db   : > { %v1966_v51 = vpop.f32.mrb[20].mxu0  ;;  %1830 = vmatprep.subr.bf16.mxu0 %v688_v48  ;;  %1977 = vmatprep.subr.bf16.mxu1 %v688_v48 }
 0x1dc   : > { %v632_v52 = vpop.f32.mrb[21].mxu0 }
 0x1dd   : > { %v1967_v53 = vpop.f32.mrb[22].mxu0 }
 0x1de   : > { %v690_v54 = vpack.c.bf16 %v1967_v53, %v1966_v51  ;;  %v635_v55 = vpop.f32.mrb[23].mxu0  ;;  %1831 = vmatpush3.bf16.msra.mxu0 %v680_v24  ;;  %1985 = vmatpush3.bf16.msra.mxu1 %v680_v24  ;;  %v2187_v24 = vld [vmem:[%s2838_s4 + $0xa0] ss:$8 sps:$4 sm:$0xff]  }
 0x1df   : > { %v689_v56 = vpack.c.bf16 %v635_v55, %v632_v52 }
 0x1e1   : > { %1832 = vmatprep.subr.bf16.mxu0 %v689_v56  ;;  %1978 = vmatprep.subr.bf16.mxu1 %v689_v56 }
 0x1e2   : > { %1833 = vmatpush3.bf16.msra.mxu0 %v681_v32  ;;  %1986 = vmatpush3.bf16.msra.mxu1 %v681_v32  ;;  %v2211_v32 = vld [vmem:[%s2838_s4 + $0xe0] ss:$8 sps:$4 sm:$0xff]  }
 0x1e3   : > { %v1970_v57 = vpop.f32.mrb[24].mxu0  ;;  %1834 = vmatprep.subr.bf16.mxu0 %v690_v54  ;;  %1979 = vmatprep.subr.bf16.mxu1 %v690_v54 }
 0x1e4   : > { %v648_v58 = vpop.f32.mrb[25].mxu0 }
 0x1e5   : > { %v1971_v59 = vpop.f32.mrb[26].mxu0 }
 0x1e6   : > { %v692_v60 = vpack.c.bf16 %v1971_v59, %v1970_v57  ;;  %v651_v61 = vpop.f32.mrb[27].mxu0  ;;  %1835 = vmatpush3.bf16.msra.mxu0 %v682_v30  ;;  %1987 = vmatpush3.bf16.msra.mxu1 %v682_v30  ;;  %v2205_v30 = vld [vmem:[%s2838_s4 + $0xd0] ss:$8 sps:$4 sm:$0xff]   ;;  %v707_v57 = vld [vmem:[#allocation2 + $0x60] sm:$0xff] }
 0x1e7   : > { %v691_v62 = vpack.c.bf16 %v651_v61, %v648_v58  ;;  %v697_v59 = vld [vmem:[#allocation2 + $0x10] sm:$0xff] }
 0x1e9   : > { %1836 = vmatprep.subr.bf16.mxu0 %v691_v62  ;;  %1980 = vmatprep.subr.bf16.mxu1 %v691_v62 }
 0x1ea   : > { %1837 = vmatpush3.bf16.msra.mxu0 %v683_v38  ;;  %1988 = vmatpush3.bf16.msra.mxu1 %v683_v38 }
 0x1eb   : > { %v1974_v63 = vpop.f32.mrb[28].mxu0  ;;  %1838 = vmatprep.subr.bf16.mxu0 %v692_v60  ;;  %1981 = vmatprep.subr.bf16.mxu1 %v692_v60 }
 0x1ec   : > { %v664_v0 = vpop.f32.mrb[29].mxu0 }
 0x1ed   : > { %v1975_v1 = vpop.f32.mrb[30].mxu0 }
 0x1ee   : > { %v694_v2 = vpack.c.bf16 %v1975_v1, %v1974_v63  ;;  %v667_v3 = vpop.f32.mrb[31].mxu0  ;;  %1839 = vmatpush3.bf16.msra.mxu0 %v684_v36  ;;  %1989 = vmatpush3.bf16.msra.mxu1 %v684_v36  ;;  %v708_v1 = vld [vmem:[#allocation2 + $0x68] sm:$0xff] }
 0x1ef   : > { %v693_v4 = vpack.c.bf16 %v667_v3, %v664_v0  ;;  %v698_v3 = vld [vmem:[#allocation2 + $0x18] sm:$0xff] }
 0x1f1   : > { %1840 = vmatprep.subr.bf16.mxu0 %v693_v4  ;;  %1982 = vmatprep.subr.bf16.mxu1 %v693_v4 }
 0x1f2   : > { %1841 = vmatpush3.bf16.msra.mxu0 %v685_v44  ;;  %1990 = vmatpush3.bf16.msra.mxu1 %v685_v44 }
 0x1f3   : > { %1842 = vmatprep.subr.bf16.mxu0 %v694_v2  ;;  %1983 = vmatprep.subr.bf16.mxu1 %v694_v2 }
 0x1f6   : > { %1843 = vmatpush3.bf16.msra.mxu0 %v686_v42  ;;  %1991 = vmatpush3.bf16.msra.mxu1 %v686_v42 }
 0x1f9   : > { %992 = vmatmul.mubr.bf16.vlgmr.msra.gmra.mrb[0].mxu1 %v2170_v5  ;;  %952 = vmatmul.mubr.bf16.vlgmr.msra.gmra.mrb[32].mxu0 %v2188_v6 }
 0x1fa   : > { %999 = vmatprep.mubr.bf16.mxu1 %v2173_v7  ;;  %959 = vmatprep.mubr.bf16.mxu0 %v2194_v8 }
 0x201   : > { %1000 = vmatmul.mubr.bf16.gmra.mrb[4].mxu1 %v2175_v9  ;;  %960 = vmatmul.mubr.bf16.gmra.mrb[36].mxu0 %v2196_v10 }
 0x202   : > { %1007 = vmatprep.mubr.bf16.mxu1 %v2176_v11  ;;  %967 = vmatprep.mubr.bf16.mxu0 %v2200_v12 }
 0x209   : > { %1008 = vmatmul.mubr.bf16.gmra.mrb[8].mxu1 %v2178_v13  ;;  %968 = vmatmul.mubr.bf16.gmra.mrb[40].mxu0 %v2202_v14  ;;  %v709_v13 = vld [vmem:[#allocation2 + $0x70] sm:$0xff] }
 0x20a   : > { %1015 = vmatprep.mubr.bf16.mxu1 %v2179_v15  ;;  %975 = vmatprep.mubr.bf16.mxu0 %v2206_v16  ;;  %v699_v15 = vld [vmem:[#allocation2 + $0x20] sm:$0xff] }
 0x211   : > { %1016 = vmatmul.mubr.bf16.gmra.mrb[12].mxu1 %v2181_v17  ;;  %976 = vmatmul.mubr.bf16.gmra.mrb[44].mxu0 %v2208_v18 }
 0x212   : > { %1023 = vmatprep.mubr.bf16.mxu1 %v2182_v19  ;;  %983 = vmatprep.mubr.bf16.mxu0 %v2212_v20 }
 0x219   : > { %1024 = vmatmul.mubr.bf16.gmra.mrb[16].mxu1 %v2184_v21  ;;  %984 = vmatmul.mubr.bf16.gmra.mrb[48].mxu0 %v2214_v22  ;;  %v710_v21 = vld [vmem:[#allocation2 + $0x78] sm:$0xff] }
 0x21a   : > { %1031 = vmatprep.mubr.bf16.mxu1 %v2185_v23  ;;  %v700_v23 = vld [vmem:[#allocation2 + $0x28] sm:$0xff] }
 0x221   : > { %1032 = vmatmul.mubr.bf16.gmra.mrb[20].mxu1 %v2187_v24 }
 0x222   : > { %1039 = vmatprep.mubr.bf16.mxu1 %v2191_v25 }
 0x229   : > { %1040 = vmatmul.mubr.bf16.gmra.mrb[24].mxu1 %v2193_v26 }
 0x22a   : > { %1047 = vmatprep.mubr.bf16.mxu1 %v2197_v27 }
 0x231   : > { %1048 = vmatmul.mubr.bf16.gmra.mrb[28].mxu1 %v2199_v28 }
 0x232   : > { %1055 = vmatprep.mubr.bf16.mxu1 %v2203_v29 }
 0x239   : > { %1056 = vmatmul.mubr.bf16.gmra.mrb[32].mxu1 %v2205_v30 }
 0x23a   : > { %1063 = vmatprep.mubr.bf16.mxu1 %v2209_v31 }
 0x241   : > { %1064 = vmatmul.mubr.bf16.gmra.mrb[36].mxu1 %v2211_v32 }
 0x242   : > { %1071 = vmatprep.mubr.bf16.mxu1 %v2215_v33  ;;  %v711_v33 = vld [vmem:[#allocation2 + $0x80] sm:$0xff] }
 0x249   : > { %1072 = vmatmul.mubr.bf16.gmra.mrb[40].mxu1 %v2217_v34 }
 0x2cc   : > { %v1874_v35 = vpop.f32.mrb[0].mxu1  ;;  %v1844_v36 = vpop.f32.mrb[32].mxu0 }
 0x2cd   : > { %v1875_v38 = vpop.f32.mrb[1].mxu1  ;;  %v1845_v40 = vpop.f32.mrb[33].mxu0 }
 0x2ce   : > { %v1876_v41 = vadd.f32 %v1875_v38, %v1874_v35  ;;  %v1877_v42 = vpop.f32.mrb[2].mxu1  ;;  %v1846_v43 = vadd.f32 %v1845_v40, %v1844_v36  ;;  %v1847_v44 = vpop.f32.mrb[34].mxu0  ;;  %v701_v35 = vld [vmem:[#allocation2 + $0x30] sm:$0xff] }
 0x2cf   : > { %v1878_v46 = vpop.f32.mrb[3].mxu1  ;;  %v1848_v48 = vpop.f32.mrb[35].mxu0 }
 0x2d0   : > { %v1090_v49 = vadd.f32 %v1876_v41, %v705_v37  ;;  %v1879_v50 = vadd.f32 %v1878_v46, %v1877_v42  ;;  %v1080_v51 = vadd.f32 %v1846_v43, %v695_v39  ;;  %v1849_v52 = vadd.f32 %v1848_v48, %v1847_v44  ;;  %v712_v41 = vld [vmem:[#allocation2 + $0x88] sm:$0xff]  ;;  %v702_v43 = vld [vmem:[#allocation2 + $0x38] sm:$0xff] }
 0x2d2   : > { %1122 = vst [vmem:[#allocation2 + $0x50] sm:$0xff] %v1090_v49  ;;  %v1091_v53 = vadd.f32 %v1879_v50, %v706_v45  ;;  %1112 = vst [vmem:[#allocation2] sm:$0xff] %v1080_v51  ;;  %v1081_v54 = vadd.f32 %v1849_v52, %v696_v47 }
 0x2d4   : > { %1123 = vst [vmem:[#allocation2 + $0x58] sm:$0xff] %v1091_v53  ;;  %v1880_v55 = vpop.f32.mrb[4].mxu1  ;;  %1113 = vst [vmem:[#allocation2 + $0x8] sm:$0xff] %v1081_v54  ;;  %v1850_v56 = vpop.f32.mrb[36].mxu0  ;;  %v713_v53 = vld [vmem:[#allocation2 + $0x90] sm:$0xff] }
 0x2d5   : > { %v1881_v58 = vpop.f32.mrb[5].mxu1  ;;  %v1851_v60 = vpop.f32.mrb[37].mxu0 }
 0x2d6   : > { %v1882_v61 = vadd.f32 %v1881_v58, %v1880_v55  ;;  %v1883_v62 = vpop.f32.mrb[6].mxu1  ;;  %v1852_v63 = vadd.f32 %v1851_v60, %v1850_v56  ;;  %v1853_v0 = vpop.f32.mrb[38].mxu0  ;;  %v703_v55 = vld [vmem:[#allocation2 + $0x40] sm:$0xff] }
 0x2d7   : > { %v1884_v2 = vpop.f32.mrb[7].mxu1  ;;  %v1854_v4 = vpop.f32.mrb[39].mxu0 }
 0x2d8   : > { %v1092_v5 = vadd.f32 %v1882_v61, %v707_v57  ;;  %v1885_v6 = vadd.f32 %v1884_v2, %v1883_v62  ;;  %v1082_v7 = vadd.f32 %v1852_v63, %v697_v59  ;;  %v1855_v8 = vadd.f32 %v1854_v4, %v1853_v0  ;;  %v714_v61 = vld [vmem:[#allocation2 + $0x98] sm:$0xff]  ;;  %v704_v63 = vld [vmem:[#allocation2 + $0x48] sm:$0xff] }
 0x2da   : > { %1124 = vst [vmem:[#allocation2 + $0x60] sm:$0xff] %v1092_v5  ;;  %v1093_v9 = vadd.f32 %v1885_v6, %v708_v1  ;;  %1114 = vst [vmem:[#allocation2 + $0x10] sm:$0xff] %v1082_v7  ;;  %v1083_v10 = vadd.f32 %v1855_v8, %v698_v3  ;;  %v715_v8 = vld [vmem:[#allocation2 + $0xa0] sm:$0xff] }
 0x2dc   : > { %1125 = vst [vmem:[#allocation2 + $0x68] sm:$0xff] %v1093_v9  ;;  %v1886_v11 = vpop.f32.mrb[8].mxu1  ;;  %1115 = vst [vmem:[#allocation2 + $0x18] sm:$0xff] %v1083_v10  ;;  %v1856_v12 = vpop.f32.mrb[40].mxu0 }
 0x2dd   : > { %v1887_v14 = vpop.f32.mrb[9].mxu1  ;;  %v1857_v16 = vpop.f32.mrb[41].mxu0 }
 0x2de   : > { %v1888_v17 = vadd.f32 %v1887_v14, %v1886_v11  ;;  %v1889_v18 = vpop.f32.mrb[10].mxu1  ;;  %v1858_v19 = vadd.f32 %v1857_v16, %v1856_v12  ;;  %v1859_v20 = vpop.f32.mrb[42].mxu0  ;;  %v716_v12 = vld [vmem:[#allocation2 + $0xa8] sm:$0xff] }
 0x2df   : > { %v1890_v22 = vpop.f32.mrb[11].mxu1  ;;  %v1860_v24 = vpop.f32.mrb[43].mxu0 }
 0x2e0   : > { %v1094_v25 = vadd.f32 %v1888_v17, %v709_v13  ;;  %v1891_v26 = vadd.f32 %v1890_v22, %v1889_v18  ;;  %v1084_v27 = vadd.f32 %v1858_v19, %v699_v15  ;;  %v1861_v28 = vadd.f32 %v1860_v24, %v1859_v20  ;;  %v717_v18 = vld [vmem:[#allocation2 + $0xb0] sm:$0xff]  ;;  %v718_v22 = vld [vmem:[#allocation2 + $0xb8] sm:$0xff] }
 0x2e2   : > { %1126 = vst [vmem:[#allocation2 + $0x70] sm:$0xff] %v1094_v25  ;;  %v1095_v29 = vadd.f32 %v1891_v26, %v710_v21  ;;  %1116 = vst [vmem:[#allocation2 + $0x20] sm:$0xff] %v1084_v27  ;;  %v1085_v30 = vadd.f32 %v1861_v28, %v700_v23  ;;  %v719_v28 = vld [vmem:[#allocation2 + $0xc0] sm:$0xff] }
 0x2e4   : > { %1127 = vst [vmem:[#allocation2 + $0x78] sm:$0xff] %v1095_v29  ;;  %v1892_v31 = vpop.f32.mrb[12].mxu1  ;;  %1117 = vst [vmem:[#allocation2 + $0x28] sm:$0xff] %v1085_v30  ;;  %v1862_v32 = vpop.f32.mrb[44].mxu0 }
 0x2e5   : > { %v1893_v34 = vpop.f32.mrb[13].mxu1  ;;  %v1863_v36 = vpop.f32.mrb[45].mxu0 }
 0x2e6   : > { %v1894_v37 = vadd.f32 %v1893_v34, %v1892_v31  ;;  %v1895_v38 = vpop.f32.mrb[14].mxu1  ;;  %v1864_v39 = vadd.f32 %v1863_v36, %v1862_v32  ;;  %v1865_v40 = vpop.f32.mrb[46].mxu0  ;;  %v720_v32 = vld [vmem:[#allocation2 + $0xc8] sm:$0xff] }
 0x2e7   : > { %v1896_v42 = vpop.f32.mrb[15].mxu1  ;;  %v1866_v44 = vpop.f32.mrb[47].mxu0 }
 0x2e8   : > { %v1096_v45 = vadd.f32 %v1894_v37, %v711_v33  ;;  %v1897_v46 = vadd.f32 %v1896_v42, %v1895_v38  ;;  %v1086_v47 = vadd.f32 %v1864_v39, %v701_v35  ;;  %v1867_v48 = vadd.f32 %v1866_v44, %v1865_v40  ;;  %v721_v38 = vld [vmem:[#allocation2 + $0xd0] sm:$0xff]  ;;  %v722_v42 = vld [vmem:[#allocation2 + $0xd8] sm:$0xff] }
 0x2ea   : > { %1128 = vst [vmem:[#allocation2 + $0x80] sm:$0xff] %v1096_v45  ;;  %v1097_v49 = vadd.f32 %v1897_v46, %v712_v41  ;;  %1118 = vst [vmem:[#allocation2 + $0x30] sm:$0xff] %v1086_v47  ;;  %v1087_v50 = vadd.f32 %v1867_v48, %v702_v43  ;;  %v723_v48 = vld [vmem:[#allocation2 + $0xe0] sm:$0xff] }
 0x2ec   : > { %1129 = vst [vmem:[#allocation2 + $0x88] sm:$0xff] %v1097_v49  ;;  %v1898_v51 = vpop.f32.mrb[16].mxu1  ;;  %1119 = vst [vmem:[#allocation2 + $0x38] sm:$0xff] %v1087_v50  ;;  %v1868_v52 = vpop.f32.mrb[48].mxu0 }
 0x2ed   : > { %v1899_v54 = vpop.f32.mrb[17].mxu1  ;;  %v1869_v56 = vpop.f32.mrb[49].mxu0 }
 0x2ee   : > { %v1900_v57 = vadd.f32 %v1899_v54, %v1898_v51  ;;  %v1901_v58 = vpop.f32.mrb[18].mxu1  ;;  %v1870_v59 = vadd.f32 %v1869_v56, %v1868_v52  ;;  %v1871_v60 = vpop.f32.mrb[50].mxu0  ;;  %v724_v52 = vld [vmem:[#allocation2 + $0xe8] sm:$0xff] }
 0x2ef   : > { %v1902_v62 = vpop.f32.mrb[19].mxu1  ;;  %v1872_v0 = vpop.f32.mrb[51].mxu0 }
 0x2f0   : > { %v1098_v1 = vadd.f32 %v1900_v57, %v713_v53  ;;  %v1903_v2 = vadd.f32 %v1902_v62, %v1901_v58  ;;  %v1088_v3 = vadd.f32 %v1870_v59, %v703_v55  ;;  %v1873_v4 = vadd.f32 %v1872_v0, %v1871_v60  ;;  %v725_v58 = vld [vmem:[#allocation2 + $0xf0] sm:$0xff]  ;;  %v726_v62 = vld [vmem:[#allocation2 + $0xf8] sm:$0xff] }
 0x2f2   : > { %1130 = vst [vmem:[#allocation2 + $0x90] sm:$0xff] %v1098_v1  ;;  %v1099_v5 = vadd.f32 %v1903_v2, %v714_v61  ;;  %1120 = vst [vmem:[#allocation2 + $0x40] sm:$0xff] %v1088_v3  ;;  %v1089_v6 = vadd.f32 %v1873_v4, %v704_v63  ;;  %v1148_v3 = vld [vmem:[#allocation2] sm:$0xff] (!%p1641_p10)  ;;  %v1149_v4 = vld [vmem:[#allocation2 + $0x8] sm:$0xff] (!%p1641_p10) }
 0x2f4   : > { %1131 = vst [vmem:[#allocation2 + $0x98] sm:$0xff] %v1099_v5  ;;  %v1904_v7 = vpop.f32.mrb[20].mxu1  ;;  %1121 = vst [vmem:[#allocation2 + $0x48] sm:$0xff] %v1089_v6  ;;  %v2931_v5 = vld [vmem:[#allocation9] ss:$0 sm:$0xff] (!%p1641_p10) }
 0x2f5   : > { %v1905_v9 = vpop.f32.mrb[21].mxu1  ;;  %v1187_v6 = vadd.f32 (!%p1641_p10), %v2931_v5, %v1148_v3 }
 0x2f6   : > { %v1906_v10 = vadd.f32 %v1905_v9, %v1904_v7  ;;  %v1907_v11 = vpop.f32.mrb[22].mxu1  ;;  %v1188_v7 = vadd.f32 (!%p1641_p10), %v2931_v5, %v1149_v4  ;;  %v1151_v9 = vld [vmem:[#allocation2 + $0x18] sm:$0xff] (!%p1641_p10) }
 0x2f7   : > { %v1908_v13 = vpop.f32.mrb[23].mxu1 }
 0x2f8   : > { %v1100_v14 = vadd.f32 %v1906_v10, %v715_v8  ;;  %v1909_v15 = vadd.f32 %v1908_v13, %v1907_v11  ;;  %v1150_v8 = vld [vmem:[#allocation2 + $0x10] sm:$0xff] (!%p1641_p10)  ;;  %v1152_v10 = vld [vmem:[#allocation2 + $0x20] sm:$0xff] (!%p1641_p10)  ;;  %v1153_v13 = vld [vmem:[#allocation2 + $0x28] sm:$0xff] (!%p1641_p10) }
 0x2f9   : > { %v1189_v11 = vadd.f32 (!%p1641_p10), %v2931_v5, %v1150_v8 }
 0x2fa   : > { %1132 = vst [vmem:[#allocation2 + $0xa0] sm:$0xff] %v1100_v14  ;;  %v1101_v16 = vadd.f32 %v1909_v15, %v716_v12  ;;  %v1190_v12 = vadd.f32 (!%p1641_p10), %v2931_v5, %v1151_v9  ;;  %v1191_v14 = vadd.f32 (!%p1641_p10), %v2931_v5, %v1152_v10  ;;  %v1154_v15 = vld [vmem:[#allocation2 + $0x30] sm:$0xff] (!%p1641_p10) }
 0x2fc   : > { %1133 = vst [vmem:[#allocation2 + $0xa8] sm:$0xff] %v1101_v16  ;;  %v1910_v17 = vpop.f32.mrb[24].mxu1  ;;  %v1155_v16 = vld [vmem:[#allocation2 + $0x38] sm:$0xff] (!%p1641_p10) }
 0x2fd   : > { %v1911_v19 = vpop.f32.mrb[25].mxu1 }
 0x2fe   : > { %v1912_v20 = vadd.f32 %v1911_v19, %v1910_v17  ;;  %v1913_v21 = vpop.f32.mrb[26].mxu1  ;;  %v1219_v17 = vmax.f32 (!%p1641_p10), %v1187_v6, 0.0  ;;  %v1192_v19 = vadd.f32 (!%p1641_p10), %v2931_v5, %v1153_v13 }
 0x2ff   : > { %v1914_v23 = vpop.f32.mrb[27].mxu1 }
 0x300   : > { %v1102_v24 = vadd.f32 %v1912_v20, %v717_v18  ;;  %v1915_v25 = vadd.f32 %v1914_v23, %v1913_v21  ;;  %v1220_v18 = vmax.f32 (!%p1641_p10), %v1188_v7, 0.0  ;;  %v1193_v20 = vadd.f32 (!%p1641_p10), %v2931_v5, %v1154_v15  ;;  %v1156_v21 = vld [vmem:[#allocation2 + $0x40] sm:$0xff] (!%p1641_p10)  ;;  %v1158_v23 = vld [vmem:[#allocation2 + $0x50] sm:$0xff] (!%p1641_p10) }
 0x302   : > { %1134 = vst [vmem:[#allocation2 + $0xb0] sm:$0xff] %v1102_v24  ;;  %v1103_v26 = vadd.f32 %v1915_v25, %v718_v22  ;;  %v1157_v22 = vld [vmem:[#allocation2 + $0x48] sm:$0xff] (!%p1641_p10)  ;;  %v1221_v24 = vmax.f32 (!%p1641_p10), %v1189_v11, 0.0  ;;  %v1222_v25 = vmax.f32 (!%p1641_p10), %v1190_v12, 0.0 }
 0x304   : > { %1135 = vst [vmem:[#allocation2 + $0xb8] sm:$0xff] %v1103_v26  ;;  %v1916_v27 = vpop.f32.mrb[28].mxu1  ;;  %v1223_v26 = vmax.f32 (!%p1641_p10), %v1191_v14, 0.0 }
 0x305   : > { %v1917_v29 = vpop.f32.mrb[29].mxu1 }
 0x306   : > { %v1918_v30 = vadd.f32 %v1917_v29, %v1916_v27  ;;  %v1919_v31 = vpop.f32.mrb[30].mxu1  ;;  %v1194_v27 = vadd.f32 (!%p1641_p10), %v2931_v5, %v1155_v16  ;;  %v1160_v29 = vld [vmem:[#allocation2 + $0x60] sm:$0xff] (!%p1641_p10) }
 0x307   : > { %v1920_v33 = vpop.f32.mrb[31].mxu1 }
 0x308   : > { %v1104_v34 = vadd.f32 %v1918_v30, %v719_v28  ;;  %v1921_v35 = vadd.f32 %v1920_v33, %v1919_v31  ;;  %v1159_v28 = vld [vmem:[#allocation2 + $0x58] sm:$0xff] (!%p1641_p10)  ;;  %v1718_v30 = vpack.c.bf16 (!%p1641_p10), %v1220_v18, %v1219_v17  ;;  %v1224_v31 = vmax.f32 (!%p1641_p10), %v1192_v19, 0.0 }
 0x309   : > { %v1195_v33 = vadd.f32 (!%p1641_p10), %v2931_v5, %v1156_v21  ;;  %v1170_v3 = vld [vmem:[#allocation2 + $0xb0] sm:$0xff] (!%p1641_p10) }
 0x30a   : > { %1136 = vst [vmem:[#allocation2 + $0xc0] sm:$0xff] %v1104_v34  ;;  %v1105_v36 = vadd.f32 %v1921_v35, %v720_v32  ;;  %v1225_v32 = vmax.f32 (!%p1641_p10), %v1193_v20, 0.0  ;;  %v1161_v34 = vld [vmem:[#allocation2 + $0x68] sm:$0xff] (!%p1641_p10)  ;;  %v1723_v35 = vpack.c.bf16 (!%p1641_p10), %v1222_v25, %v1221_v24  ;;  %1719 = vst [vmem:[%s2863_s11] sm:$0xff] (!%p1641_p10), %v1718_v30   ;;  %v1209_v19 = vadd.f32 (!%p1641_p10), %v2931_v5, %v1170_v3 }
 0x30b   : > { %v1171_v4 = vld [vmem:[#allocation2 + $0xb8] sm:$0xff] (!%p1641_p10) }
 0x30c   : > { %1137 = vst [vmem:[#allocation2 + $0xc8] sm:$0xff] %v1105_v36  ;;  %v1922_v37 = vpop.f32.mrb[32].mxu1  ;;  %v1226_v36 = vmax.f32 (!%p1641_p10), %v1194_v27, 0.0  ;;  %1795 = vst [vmem:[%s2863_s11 + $0x8] sm:$0xff] (!%p1641_p10), %v1723_v35   ;;  %v1210_v20 = vadd.f32 (!%p1641_p10), %v2931_v5, %v1171_v4 }
 0x30d   : > { %v1923_v39 = vpop.f32.mrb[33].mxu1 }
 0x30e   : > { %v1924_v40 = vadd.f32 %v1923_v39, %v1922_v37  ;;  %v1925_v41 = vpop.f32.mrb[34].mxu1  ;;  %v1196_v37 = vadd.f32 (!%p1641_p10), %v2931_v5, %v1157_v22  ;;  %v1162_v39 = vld [vmem:[#allocation2 + $0x70] sm:$0xff] (!%p1641_p10)  ;;  %v1242_v30 = vmax.f32 (!%p1641_p10), %v1210_v20, 0.0 }
 0x30f   : > { %v1926_v43 = vpop.f32.mrb[35].mxu1 }
 0x310   : > { %v1106_v44 = vadd.f32 %v1924_v40, %v721_v38  ;;  %v1927_v45 = vadd.f32 %v1926_v43, %v1925_v41  ;;  %v1197_v38 = vadd.f32 (!%p1641_p10), %v2931_v5, %v1158_v23  ;;  %v1163_v40 = vld [vmem:[#allocation2 + $0x78] sm:$0xff] (!%p1641_p10)  ;;  %v1728_v41 = vpack.c.bf16 (!%p1641_p10), %v1224_v31, %v1223_v26 }
 0x311   : > { %v1198_v43 = vadd.f32 (!%p1641_p10), %v2931_v5, %v1159_v28  ;;  %v1172_v10 = vld [vmem:[#allocation2 + $0xc0] sm:$0xff] (!%p1641_p10) }
 0x312   : > { %1138 = vst [vmem:[#allocation2 + $0xd0] sm:$0xff] %v1106_v44  ;;  %v1107_v46 = vadd.f32 %v1927_v45, %v722_v42  ;;  %v1227_v42 = vmax.f32 (!%p1641_p10), %v1195_v33, 0.0  ;;  %v1199_v44 = vadd.f32 (!%p1641_p10), %v2931_v5, %v1160_v29  ;;  %v1164_v45 = vld [vmem:[#allocation2 + $0x80] sm:$0xff] (!%p1641_p10)  ;;  %1796 = vst [vmem:[%s2863_s11 + $0x10] sm:$0xff] (!%p1641_p10), %v1728_v41   ;;  %v1211_v24 = vadd.f32 (!%p1641_p10), %v2931_v5, %v1172_v10 }
 0x313   : > { %v1173_v11 = vld [vmem:[#allocation2 + $0xc8] sm:$0xff] (!%p1641_p10)  ;;  %v1241_v29 = vmax.f32 (!%p1641_p10), %v1209_v19, 0.0 }
 0x314   : > { %1139 = vst [vmem:[#allocation2 + $0xd8] sm:$0xff] %v1107_v46  ;;  %v1928_v47 = vpop.f32.mrb[36].mxu1  ;;  %v1165_v46 = vld [vmem:[#allocation2 + $0x88] sm:$0xff] (!%p1641_p10)  ;;  %v1212_v25 = vadd.f32 (!%p1641_p10), %v2931_v5, %v1173_v11  ;;  %v1243_v35 = vmax.f32 (!%p1641_p10), %v1211_v24, 0.0 }
 0x315   : > { %v1929_v49 = vpop.f32.mrb[37].mxu1 }
 0x316   : > { %v1930_v50 = vadd.f32 %v1929_v49, %v1928_v47  ;;  %v1931_v51 = vpop.f32.mrb[38].mxu1  ;;  %v1733_v47 = vpack.c.bf16 (!%p1641_p10), %v1226_v36, %v1225_v32  ;;  %v1229_v49 = vmax.f32 (!%p1641_p10), %v1197_v38, 0.0  ;;  %v1244_v36 = vmax.f32 (!%p1641_p10), %v1212_v25, 0.0 }
 0x317   : > { %v1932_v53 = vpop.f32.mrb[39].mxu1  ;;  %v1773_v38 = vpack.c.bf16 (!%p1641_p10), %v1242_v30, %v1241_v29 }
 0x318   : > { %v1108_v54 = vadd.f32 %v1930_v50, %v723_v48  ;;  %v1933_v55 = vadd.f32 %v1932_v53, %v1931_v51  ;;  %v1228_v48 = vmax.f32 (!%p1641_p10), %v1196_v37, 0.0  ;;  %v1200_v50 = vadd.f32 (!%p1641_p10), %v2931_v5, %v1161_v34  ;;  %v1166_v51 = vld [vmem:[#allocation2 + $0x90] sm:$0xff] (!%p1641_p10)  ;;  %1797 = vst [vmem:[%s2863_s11 + $0x18] sm:$0xff] (!%p1641_p10), %v1733_v47  }
 0x319   : > { %v1231_v53 = vmax.f32 (!%p1641_p10), %v1199_v44, 0.0  ;;  %v1174_v16 = vld [vmem:[#allocation2 + $0xd0] sm:$0xff] (!%p1641_p10)  ;;  %1805 = vst [vmem:[%s2863_s11 + $0x58] sm:$0xff] (!%p1641_p10), %v1773_v38  }
 0x31a   : > { %1140 = vst [vmem:[#allocation2 + $0xe0] sm:$0xff] %v1108_v54  ;;  %v1109_v56 = vadd.f32 %v1933_v55, %v724_v52  ;;  %v1230_v52 = vmax.f32 (!%p1641_p10), %v1198_v43, 0.0  ;;  %v1201_v54 = vadd.f32 (!%p1641_p10), %v2931_v5, %v1162_v39  ;;  %v1202_v55 = vadd.f32 (!%p1641_p10), %v2931_v5, %v1163_v40 }
 0x31b   : > { %v1175_v21 = vld [vmem:[#allocation2 + $0xd8] sm:$0xff] (!%p1641_p10)  ;;  %v1213_v31 = vadd.f32 (!%p1641_p10), %v2931_v5, %v1174_v16 }
 0x31c   : > { %1141 = vst [vmem:[#allocation2 + $0xe8] sm:$0xff] %v1109_v56  ;;  %v1934_v57 = vpop.f32.mrb[40].mxu1  ;;  %v1167_v56 = vld [vmem:[#allocation2 + $0x98] sm:$0xff] (!%p1641_p10)  ;;  %v1214_v37 = vadd.f32 (!%p1641_p10), %v2931_v5, %v1175_v21 }
 0x31d   : > { %v1935_v59 = vpop.f32.mrb[41].mxu1  ;;  %v1206_v9 = vadd.f32 (!%p1641_p10), %v2931_v5, %v1167_v56  ;;  %v1245_v39 = vmax.f32 (!%p1641_p10), %v1213_v31, 0.0 }
 0x31e   : > { %v1936_v60 = vadd.f32 %v1935_v59, %v1934_v57  ;;  %v1937_v61 = vpop.f32.mrb[42].mxu1  ;;  %1147 = sbr.rel (%p1641_p10) target bundleno = 819 (0x333), region = 60  ;;  %v1738_v57 = vpack.c.bf16 (!%p1641_p10), %v1228_v48, %v1227_v42  ;;  %v1203_v59 = vadd.f32 (!%p1641_p10), %v2931_v5, %v1164_v45  ;;  %v1778_v42 = vpack.c.bf16 (!%p1641_p10), %v1244_v36, %v1243_v35 }
 0x31f   : > { %v1938_v63 = vpop.f32.mrb[43].mxu1  ;;  %v1238_v18 = vmax.f32 (!%p1641_p10), %v1206_v9, 0.0  ;;  %v1246_v43 = vmax.f32 (!%p1641_p10), %v1214_v37, 0.0 }
 0x320   : > { %v1110_v0 = vadd.f32 %v1936_v60, %v725_v58  ;;  %v1939_v1 = vadd.f32 %v1938_v63, %v1937_v61  ;;  %v1232_v58 = vmax.f32 (!%p1641_p10), %v1200_v50, 0.0  ;;  %v1204_v60 = vadd.f32 (!%p1641_p10), %v2931_v5, %v1165_v46  ;;  %v1168_v61 = vld [vmem:[#allocation2 + $0xa0] sm:$0xff] (!%p1641_p10)  ;;  %1798 = vst [vmem:[%s2863_s11 + $0x20] sm:$0xff] (!%p1641_p10), %v1738_v57   ;;  %1806 = vst [vmem:[%s2863_s11 + $0x60] sm:$0xff] (!%p1641_p10), %v1778_v42  }
 0x321   : > { %v1743_v63 = vpack.c.bf16 (!%p1641_p10), %v1230_v52, %v1229_v49  ;;  %v1235_v7 = vmax.f32 (!%p1641_p10), %v1203_v59, 0.0  ;;  %v1207_v14 = vadd.f32 (!%p1641_p10), %v2931_v5, %v1168_v61  ;;  %v1176_v26 = vld [vmem:[#allocation2 + $0xe0] sm:$0xff] (!%p1641_p10)  ;;  %v1783_v48 = vpack.c.bf16 (!%p1641_p10), %v1246_v43, %v1245_v39 }
 0x322   : > { %1142 = vst [vmem:[#allocation2 + $0xf0] sm:$0xff] %v1110_v0  ;;  %v1111_v2 = vadd.f32 %v1939_v1, %v726_v62  ;;  %v1169_v62 = vld [vmem:[#allocation2 + $0xa8] sm:$0xff] (!%p1641_p10)  ;;  %v1233_v0 = vmax.f32 (!%p1641_p10), %v1201_v54, 0.0  ;;  %v1234_v1 = vmax.f32 (!%p1641_p10), %v1202_v55, 0.0  ;;  %v1748_v6 = vpack.c.bf16 (!%p1641_p10), %v1232_v58, %v1231_v53 }
 0x323   : > { %v1236_v8 = vmax.f32 (!%p1641_p10), %v1204_v60, 0.0  ;;  %1799 = vst [vmem:[%s2863_s11 + $0x28] sm:$0xff] (!%p1641_p10), %v1743_v63   ;;  %v1208_v15 = vadd.f32 (!%p1641_p10), %v2931_v5, %v1169_v62  ;;  %v1239_v22 = vmax.f32 (!%p1641_p10), %v1207_v14, 0.0  ;;  %v1177_v27 = vld [vmem:[#allocation2 + $0xe8] sm:$0xff] (!%p1641_p10)  ;;  %v1215_v40 = vadd.f32 (!%p1641_p10), %v2931_v5, %v1176_v26  ;;  %1807 = vst [vmem:[%s2863_s11 + $0x68] sm:$0xff] (!%p1641_p10), %v1783_v48  }
 0x324   : > { %1143 = vst [vmem:[#allocation2 + $0xf8] sm:$0xff] %v1111_v2  ;;  %v1205_v2 = vadd.f32 (!%p1641_p10), %v2931_v5, %v1166_v51  ;;  %v1753_v12 = vpack.c.bf16 (!%p1641_p10), %v1234_v1, %v1233_v0  ;;  %1800 = vst [vmem:[%s2863_s11 + $0x30] sm:$0xff] (!%p1641_p10), %v1748_v6   ;;  %v1216_v41 = vadd.f32 (!%p1641_p10), %v2931_v5, %v1177_v27 }
 0x325   : > { %v1758_v17 = vpack.c.bf16 %v1236_v8, %v1235_v7  ;;  %v1240_v23 = vmax.f32 %v1208_v15, 0.0  ;;  %v1247_v46 = vmax.f32 %v1215_v40, 0.0 }
 0x326   : > { %v1237_v13 = vmax.f32 %v1205_v2, 0.0  ;;  %1801 = vst [vmem:[%s2863_s11 + $0x38] sm:$0xff] %v1753_v12   ;;  %v1248_v47 = vmax.f32 %v1216_v41, 0.0 }
 0x327   : > { %1802 = vst [vmem:[%s2863_s11 + $0x40] sm:$0xff] %v1758_v17   ;;  %v1768_v34 = vpack.c.bf16 %v1240_v23, %v1239_v22 }
 0x328   : > { %v1763_v28 = vpack.c.bf16 %v1238_v18, %v1237_v13  ;;  %v1788_v51 = vpack.c.bf16 %v1248_v47, %v1247_v46 }
 0x329   : > { %v1178_v32 = vld [vmem:[#allocation2 + $0xf0] sm:$0xff]  ;;  %1804 = vst [vmem:[%s2863_s11 + $0x50] sm:$0xff] %v1768_v34  }
 0x32a   : > { %1803 = vst [vmem:[%s2863_s11 + $0x48] sm:$0xff] %v1763_v28   ;;  %v1217_v44 = vadd.f32 %v2931_v5, %v1178_v32  ;;  %1808 = vst [vmem:[%s2863_s11 + $0x70] sm:$0xff] %v1788_v51  }
 0x32b   : > { %v1179_v33 = vld [vmem:[#allocation2 + $0xf8] sm:$0xff] }
 0x32c   : > { %v1218_v45 = vadd.f32 %v2931_v5, %v1179_v33  ;;  %v1249_v49 = vmax.f32 %v1217_v44, 0.0 }
 0x32e   : > { %v1250_v50 = vmax.f32 %v1218_v45, 0.0 }
 0x330   : > { %v1793_v52 = vpack.c.bf16 %v1250_v50, %v1249_v49 }
 0x332   : > { %1809 = vst [vmem:[%s2863_s11 + $0x78] sm:$0xff] %v1793_v52  }
 0x333 PF: > { %s3132_s30 = sld [smem:[#allocation20_spill]]  ;;  %s3134_s14 = sld [smem:[#allocation22_spill]] }
 0x334   : > { %s3135_s2 = sld [smem:[#allocation29_spill]]  ;;  %s1425_s4 = sshll.u32 %s2863_s11, 4  ;;  %s2988_s4 = int_to_ptr.vmem [resolvable:$true] %s1425_s4 }
 0x335   : > { %s2992_s3 = scalar_lea.sflag [#allocation5], %s297_s18  ;;  %s2334_s27 = scalar_lea.vmem %s2988_s4, 2048 }
 0x336   : > { %p2335_p0 = scmp.ne.s32.totalorder %s2988_s4, %s2334_s27  ;;  %s2504_s5 = smov [#allocation11]  }
 0x337   : > { %s2338_s10 = sshll.u32 %s2504_s5, 4  ;;  %s2339_s10 = int_to_ptr.vmem [resolvable:$false] %s2338_s10 }
 0x338   : > { %s2340_s13 = scalar_lea.vmem %s2339_s10, 4096  ;;  %p2341_p12 = scmp.lt.s32.totalorder %s2988_s4, %s2339_s10 }
 0x339   : > { %s1714_s12 = sshll.u32 %s3132_s30, 11  ;;  %p3136_p9 = scmp.ne.s32.totalorder %s3134_s14, 0 }
 0x33a   : > { %s2985_s21 = scalar_lea.hbm %s3135_s2, %s1714_s12  ;;  %p2342_p5 = scmp.lt.s32.totalorder %s2340_s13, %s2334_s27 }
 0x33b   : > { %p2336_p13 = pnand %p2335_p0, %p3136_p9 }
 0x33c   : > { %p2343_p4 = por %p2342_p5, %p2341_p12 }
 0x33d   : > { %p2337_p8 = pneg %p2336_p13 }
 0x33f   : > { %p2344_p7 = pnand %p2343_p4, %p2337_p8 }
 0x341   : > { %2347 = shalt.err (!%p2344_p7)
}
 0x342   : > { %s2348_s6 = scalar_lea.hbm %s2985_s21, 2048  ;;  %s2352_s11 = scalar_lea.hbm %s3135_s2, 4096 }
 0x343   : > { %p2349_p6 = scmp.ne.s32.totalorder %s2985_s21, %s2348_s6  ;;  %p2353_p3 = scmp.lt.u32.totalorder %s2985_s21, %s3135_s2 }
 0x344   : > { %p2354_p11 = scmp.lt.u32.totalorder %s2352_s11, %s2348_s6  ;;  %p2356_p0 = scmp.lt.u32.totalorder %s2348_s6, %s2985_s21 }
 0x345   : > { %p2350_p1 = pnand %p2349_p6, %p3136_p9 }
 0x346   : > { %p2355_p10 = por %p2354_p11, %p2353_p3 }
 0x347   : > { %p2351_p2 = pneg %p2350_p1 }
 0x348   : > { %p2357_p13 = por %p2356_p0, %p2355_p10 }
 0x34a   : > { %p2358_p8 = pnand %p2357_p13, %p2351_p2 }
 0x34c   : > { %2361 = shalt.err (!%p2358_p8)
}
 0x34d   : > { %s2505_s30 = smov 64   ;;  %s2506_s24 = smov 4  }
 0x34e   : > { %2004 = dma.vmem_to_hbm [thread:$0]  (%p3136_p9), %s2988_s4, 2048, %s2985_s21, %s2992_s3, %s2505_s30, %s2505_s30, %s2506_s24  }
 0x34f PF: > { %s3137_s12 = sld [smem:[#allocation17_spill]]  ;;  %s3138_s15 = sld [smem:[#allocation23_spill]] }
 0x350   : > { %p2029_p12 = scmp.ge.s32.totalorder %s2492_s28, 2 }
 0x355   : > { %s1440_s0 = sand.u32 1, %s3137_s12   ;;  %p3139_p5 = scmp.ne.s32.totalorder %s3138_s15, 0 }
 0x356   : > { %s1441_s27 = scalar_lea.sflag [#allocation5], %s1440_s0 }
 0x357   : > { %p2021_p4 = pnand %p2029_p12, %p3139_p5 }
 0x359   : > { %2435 = dma.done.wait (!%p2021_p4), %s1441_s27, 2048  }
 0x35a   : > { %2437 = vsyncadd (!%p2021_p4), %s1441_s27, 4294965248  ;;  %s24_s28 = sadd.s32 1, %s2492_s28   ;;  %s3141_s15 = sld [smem:[#allocation18_spill]] }
 0x35b   : > { %p3021_p7 = scmp.ge.s32.totalorder %s24_s28, 6   ;;  %s3142_s14 = sld [smem:[#allocation21_spill]] }
 0x35c   : > { %s3143_s4 = sld [smem:[#allocation24_spill]]  ;;  %s3144_s27 = sld [smem:[#allocation25_spill]] }
 0x35d   : > { %s3145_s16 = smov %s2448_s17  ;;  %s3146_s17 = smov %s2729_s25 }
 0x35e   : > { %s3147_s18 = smov %s2456_s19  ;;  %s3148_s19 = smov %s2460_s20 }
 0x35f   : > { %s3149_s20 = smov %s2785_s8  ;;  %s3150_s21 = smov %s2468_s22 }
 0x360   : > { %s3151_s22 = smov %s2472_s23  ;;  %s3152_s23 = smov %s2732_s9 }
 0x361   : > { %s3153_s24 = smov %s2484_s26  ;;  %s3154_s25 = smov %s3142_s14 }
 0x362   : > { %s3155_s26 = smov %s3143_s4  ;;  %23 = sbr.rel (!%p3021_p7) target bundleno = 18 (0x12), region = 110 }
 0x369   :  { %1446 = vsyncpa [#allocation4], 1 }
 0x36a   :  { %1448 = vsyncpa [#allocation4 + $0x1], 1 }
 0x36b   :  { %1449 = vsyncpa [#allocation7], 1 }
 0x36c   :  { %1451 = vsyncpa [#allocation7 + $0x1], 1 }
 0x36d   :  { %1452 = vsyncpa [#allocation10], 1 }
 0x36e   :  { %1453 = vsyncpa [#allocation5], 1 }
 0x36f   :  { %1455 = vsyncpa [#allocation5 + $0x1], 1 }

</bundles_post_ra>
